<compile_context>
chip_gen: v7x
topology: tpu7x:2x2x1
jax: 0.10.0
libtpu: 0.0.40
codegen_flags: <defaults>
</compile_context>

<pallas_src>
import jax
import jax.numpy as jnp
from jax.experimental import pallas as pl
from jax.experimental.pallas import tpu as pltpu


_LANE = 128
# 2 MiB per tile -> ~8 MiB with input+output double-buffered, which fits
# v5e's 16 MiB scoped-VMEM default and v7x's tighter 64 MiB physical VMEM
# (32 MiB scoped default) with plenty of headroom.
_TILE_BYTE_BUDGET = 2 << 20
_DIM_CAP = 1024                 # keeps DMA rows long while bounding tile size
_MIN_PALLAS_BYTES = 1 << 20     # below this, a fused XLA transpose wins
_MAX_TILE_WASTE = 2.0           # boundary-overhang work ratio before bailing
_VMEM_LIMIT_BYTES = 32 * 1024 * 1024


def _round_up(x, m):
    return ((x + m - 1) // m) * m


def _pick_tiles(T, C, itemsize):
    """Jointly pick (tT, tC): multiples of 128, capped, under the byte budget.

    No divisibility requirement against T/C -- the grid uses cdiv and the last
    block along each axis simply overhangs (Pallas clips the writeback).
    Greedily shrinking the larger dim first keeps both dims >= 256 whenever
    the budget allows (long contiguous DMA rows on both the read and the
    strided transposed writeback), and lets a small hidden dim (C = 256/384)
    still produce large tiles by growing tT.
    """
    tT = min(_round_up(T, _LANE), _DIM_CAP)
    tC = min(_round_up(C, _LANE), _DIM_CAP)
    while tT * tC * itemsize > _TILE_BYTE_BUDGET:
        if tT >= tC and tT > _LANE:
            tT -= _LANE
        elif tC > _LANE:
            tC -= _LANE
        else:
            break
    return tT, tC


def _transpose_tile_kernel(x_ref, o_ref):
    # x_ref: (tT, tC) -> o_ref: (tC, tT).  The batch dim is Squeezed in the
    # BlockSpec, so Mosaic sees a plain 2-D XLU transpose.  The kernel is
    # HBM-bandwidth bound on every generation, so nothing fancier (MXU
    # identity matmul, extra buffering) is worthwhile.
    o_ref[...] = x_ref[...].T


def _transpose_last_two_pallas(x3, B, T, C):
    itemsize = jnp.dtype(x3.dtype).itemsize
    tT, tC = _pick_tiles(T, C, itemsize)
    grid = (B, pl.cdiv(T, tT), pl.cdiv(C, tC))
    return pl.pallas_call(
        _transpose_tile_kernel,
        out_shape=jax.ShapeDtypeStruct((B, C, T), x3.dtype),
        grid=grid,
        in_specs=[
            pl.BlockSpec((pl.Squeezed(), tT, tC), lambda b, i, j: (b, i, j)),
        ],
        out_specs=pl.BlockSpec((pl.Squeezed(), tC, tT),
                               lambda b, i, j: (b, j, i)),
        compiler_params=pltpu.CompilerParams(
            # Every grid step is independent -> shard across both TensorCores
            # on v7x; no reduction axis exists.
            dimension_semantics=("parallel", "parallel", "parallel"),
            vmem_limit_bytes=_VMEM_LIMIT_BYTES,
        ),
    )(x3)


class Transpose:
    """JAX/Pallas equivalent of the PyTorch Transpose(dim_1, dim_2) module."""

    def __init__(self, dim_1, dim_2):
        self.dim_1 = dim_1
        self.dim_2 = dim_2

    def __call__(self, x):
        nd = x.ndim
        d1 = self.dim_1 % nd
        d2 = self.dim_2 % nd
        if d1 == d2:
            return x
        lo, hi = sorted((d1, d2))
        if nd < 2 or (lo, hi) != (nd - 2, nd - 1):
            # TODO(synk): non-trailing axis swaps are pure layout glue; keep
            # them as a plain XLA transpose (it fuses into consumers).
            return jnp.swapaxes(x, d1, d2)

        # TODO(synk): when the consumer is the Conv1d/matmul, fold this swap
        # into the consumer's dot_general dimension_numbers instead of paying
        # a standalone HBM read+write here.

        lead_shape = x.shape[:-2]
        T, C = x.shape[-2], x.shape[-1]
        B = 1
        for s in lead_shape:
            B *= s

        itemsize = jnp.dtype(x.dtype).itemsize
        total_bytes = B * T * C * itemsize
        waste = (_round_up(T, _LANE) * _round_up(C, _LANE)) / float(T * C)
        if (min(T, C) < _LANE
                or total_bytes < _MIN_PALLAS_BYTES
                or waste > _MAX_TILE_WASTE):
            # Tiny FastSpeech2-like planes (or ones dominated by boundary
            # overhang): pallas_call launch overhead + masked boundary work
            # would dominate; XLA's transpose fuses into the consumer.
            return jnp.swapaxes(x, d1, d2)

        x3 = x.reshape(B, T, C)
        out3 = _transpose_last_two_pallas(x3, B, T, C)
        return out3.reshape(*lead_shape, C, T)


if __name__ == "__main__":
    key = jax.random.PRNGKey(0)
    module = Transpose(-1, -2)

    # Small FastSpeech2-like (batch, seq, hidden): takes the bypass path.
    x = jax.random.normal(key, (2, 16, 32), dtype=jnp.float32)
    y = jax.block_until_ready(module(x))
    assert y.shape == (2, 32, 16), y.shape
    assert y.dtype == x.dtype
    assert bool(jnp.array_equal(y, jnp.swapaxes(x, -1, -2)))

    # Non-128-aligned on both axes: Pallas path, single boundary tile per
    # batch, clipped overhang on T and C.
    x2 = jax.random.normal(key, (2, 500, 300), dtype=jnp.float32)
    y2 = jax.block_until_ready(module(x2))
    assert y2.shape == (2, 300, 500), y2.shape
    assert bool(jnp.array_equal(y2, jnp.swapaxes(x2, -1, -2)))

    # 128-aligned hidden, overhang only along T.
    x3 = jax.random.normal(key, (2, 400, 384), dtype=jnp.float32)
    y3 = jax.block_until_ready(module(x3))
    assert bool(jnp.array_equal(y3, jnp.swapaxes(x3, -1, -2)))

    # Multi-tile grid: exercises the (i, j) -> (j, i) output index map across
    # several tiles plus an output-side overhang on C.
    x4 = jax.random.normal(key, (1, 1280, 1152), dtype=jnp.float32)
    y4 = jax.block_until_ready(module(x4))
    assert bool(jnp.array_equal(y4, jnp.swapaxes(x4, -1, -2)))

    # Non-trailing axis pair falls back to XLA swapaxes.
    x5 = jax.random.normal(key, (2, 4, 16, 16), dtype=jnp.float32)
    y5 = jax.block_until_ready(Transpose(1, 3)(x5))
    assert bool(jnp.array_equal(y5, jnp.swapaxes(x5, 1, 3)))

    print("KERNEL_OK")
</pallas_src>

<mosaic_0001>
module attributes {stable_mosaic.version = 11 : i64} {
  func.func @_transpose_tile_kernel(%arg0: i32, %arg1: i32, %arg2: i32, %arg3: memref<1x512x384xf32, #tpu.memory_space<vmem>>, %arg4: memref<1x384x512xf32, #tpu.memory_space<vmem>>) attributes {dimension_semantics = [#tpu.dimension_semantics<parallel>, #tpu.dimension_semantics<parallel>, #tpu.dimension_semantics<parallel>], iteration_bounds = array<i64: 2, 1, 1>, scalar_prefetch = 0 : i64, scratch_operands = 0 : i64, tpu.core_type = #tpu.core_type<tc>, window_params = [{transform_indices = @transform_0, window_bounds = array<i64: 1, 512, 384>}, {transform_indices = @transform_1, window_bounds = array<i64: 1, 384, 512>}]} {
    %c0 = arith.constant 0 : index
    %c0_0 = arith.constant 0 : index
    %c0_1 = arith.constant 0 : index
    %0 = vector.load %arg3[%c0, %c0_0, %c0_1] : memref<1x512x384xf32, #tpu.memory_space<vmem>>, vector<1x512x384xf32>
    %1 = vector.shape_cast %0 : vector<1x512x384xf32> to vector<512x384xf32>
    %2 = tpu.transpose %1, [1, 0] : vector<512x384xf32> -> vector<384x512xf32>
    %c0_2 = arith.constant 0 : index
    %c0_3 = arith.constant 0 : index
    %c0_4 = arith.constant 0 : index
    %3 = vector.load %arg4[%c0_2, %c0_3, %c0_4] : memref<1x384x512xf32, #tpu.memory_space<vmem>>, vector<1x384x512xf32>
    %4 = vector.shape_cast %3 : vector<1x384x512xf32> to vector<384x512xf32>
    %5 = vector.shape_cast %2 : vector<384x512xf32> to vector<1x384x512xf32>
    tpu.vector_store %arg4[%c0_2, %c0_3, %c0_4], %5 {strides = array<i32>} : memref<1x384x512xf32, #tpu.memory_space<vmem>>, vector<1x384x512xf32>,
    return
  }
  func.func @transform_0(%arg0: i32, %arg1: i32, %arg2: i32) -> (i32, i32, i32) {
    %c0_i32 = arith.constant 0 : i32
    return %arg0, %arg1, %arg2 : i32, i32, i32
  }
  func.func @transform_1(%arg0: i32, %arg1: i32, %arg2: i32) -> (i32, i32, i32) {
    %c0_i32 = arith.constant 0 : i32
    return %arg0, %arg2, %arg1 : i32, i32, i32
  }
}

</mosaic_0001>

<bundles_post_ra>
// kernel: tpu_custom_call.1
= control target key start
LH: loop header
LB: loop body
LE: loop exit
PB: predicated region body
PF: predicated region fallthrough
CT: control target
= control target key end

     0   :  { %s1513_s6 = smov 0   ;;  %s1515_s7 = smov 0   ;;  %s2166_s0 = inlined_call_operand.vmem [shape: f32[2,500,300], index: 0, kind: input, shape index: {}]   ;;  %s2167_s1 = inlined_call_operand.vmem [shape: f32[2,300,500], index: 1, kind: output, shape index: {}]  }
   0x1   :  { %s1517_s8 = smov 0   ;;  %s1519_s9 = smov 0  }
   0x2   :  { %s1521_s10 = smov 0  }
   0x3 LB: > { %s1275_s11 = sadd.s32 4294967295, %s1469_s10   ;;  %s30_s12 = sadd.s32 1, %s1465_s9  ;;  %s1469_s10 = sphi %s1521_s10, %s11_s10   ;;  %s1465_s9 = sphi %s1519_s9, %s2178_s9   ;;  %s1461_s8 = sphi %s1517_s8, %s2177_s8   ;;  %s1457_s7 = sphi %s1515_s7, %s2176_s7   ;;  %s1453_s6 = sphi %s1513_s6, %s2175_s6  }
   0x4   : > { %p32_p0 = scmp.ge.s32.totalorder %s30_s12, 2  ;;  %s71_s13 = sadd.s32 1, %s1457_s7 }
   0x5   : > { %p81_p1 = scmp.ne.s32.totalorder %s1457_s7, %s1453_s6  ;;  %p82_p2 = scmp.eq.s32.totalorder %s1275_s11, 1 }
   0x6   : > { %s2180_s12 = smov (%p32_p0, %s30_s12), 0  ;;  %p1279_p4 = scmp.ge.s32.totalorder %s1469_s10, 1 }
   0x7   : > { %p1545_p3 = por %p82_p2, %p81_p1  ;;  %s64_s15 = ssub.s32 %s1465_s9, %s2180_s12 }
   0x8   : > { %p131_p5 = scmp.lt.s32.totalorder %s1469_s10, 3  ;;  %p69_p6 = scmp.eq.s32.totalorder %s64_s15, 0 }
   0xa   : > { %p132_p7 = pnand %p1279_p4, %p131_p5 }
   0xb   : > { %s1554_s16 = scalar_select %p69_p6, %s1457_s7, %s71_s13  }
   0xc   : > { %135 = sbr.rel (%p132_p7) target bundleno = 584 (0x248), region = 24  ;;  %p167_p8 = scmp.lt.s32.totalorder (!%p132_p7), %s1461_s8, 1 }
   0xd   : > { %s159_s22 = sand.u32 (!%p132_p7), 1, %s1453_s6  }
   0xe   : > { %s1292_s23 = smul.u32 (!%p132_p7), 1536, %s159_s22 }
  0x10   : > { %s1630_s24 = scalar_lea.vmem (!%p132_p7), [#allocation2], %s1292_s23  }
  0x13   : > { %s168_s17 = scalar_select %p167_p8, %s1461_s8, 1 }
  0x14   : > { %s1294_s25 = smul.u32 (%p1545_p3), 1216, %s1461_s8  ;;  %s2170_s30 = smov (%p1545_p3), %s1630_s24 }
  0x15   : > { %s1293_s18 = smul.u32 1512, %s168_s17  ;;  %s1964_s2 = smov (%p1545_p3), 0  }
  0x16   : > { %s1956_s28 = scalar_lea.vmem (%p1545_p3), %s2167_s1, %s1294_s25   ;;  %s1966_s3 = smov (%p1545_p3), 0  }
  0x17   : > { %s1561_s21 = scalar_lea.vmem %s2166_s0, %s1293_s18  ;;  %s2169_s29 = smov (%p1545_p3), %s1956_s28 }
  0x18   : > { %v190_v0 = vld [vmem:[%s1561_s21 + $0x8] sm:$0xff]  ;;  %v189_v1 = vld [vmem:[%s1561_s21] sm:$0xff]  ;;  %v192_v3 = vld [vmem:[%s1561_s21 + $0x18] sm:$0xff] }
  0x19   : > { %413 = vxpose.xlu1.b32.start [1/16] %v190_v0, 128  ;;  %381 = vxpose.xlu0.b32.start [1/16] %v189_v1, 128  ;;  %v193_v2 = vld [vmem:[%s1561_s21 + $0x20] sm:$0xff]  ;;  %v196_v4 = vld [vmem:[%s1561_s21 + $0x38] sm:$0xff]  ;;  %v195_v5 = vld [vmem:[%s1561_s21 + $0x30] sm:$0xff] }
  0x1a   : > { %v199_v6 = vld [vmem:[%s1561_s21 + $0x50] sm:$0xff]  ;;  %v198_v7 = vld [vmem:[%s1561_s21 + $0x48] sm:$0xff]  ;;  %v201_v9 = vld [vmem:[%s1561_s21 + $0x60] sm:$0xff] }
  0x1b   : > { %v202_v8 = vld [vmem:[%s1561_s21 + $0x68] sm:$0xff]  ;;  %v205_v10 = vld [vmem:[%s1561_s21 + $0x80] sm:$0xff]  ;;  %v204_v11 = vld [vmem:[%s1561_s21 + $0x78] sm:$0xff] }
  0x1c   : > { %v208_v12 = vld [vmem:[%s1561_s21 + $0x98] sm:$0xff]  ;;  %v207_v13 = vld [vmem:[%s1561_s21 + $0x90] sm:$0xff]  ;;  %v210_v15 = vld [vmem:[%s1561_s21 + $0xa8] sm:$0xff] }
  0x1d   : > { %414 = vxpose.xlu1.b32.cont [2/16] %v193_v2, 128  ;;  %382 = vxpose.xlu0.b32.cont [2/16] %v192_v3, 128  ;;  %v211_v14 = vld [vmem:[%s1561_s21 + $0xb0] sm:$0xff]  ;;  %v214_v16 = vld [vmem:[%s1561_s21 + $0xc8] sm:$0xff]  ;;  %v213_v17 = vld [vmem:[%s1561_s21 + $0xc0] sm:$0xff] }
  0x1e   : > { %v217_v18 = vld [vmem:[%s1561_s21 + $0xe0] sm:$0xff]  ;;  %v216_v19 = vld [vmem:[%s1561_s21 + $0xd8] sm:$0xff]  ;;  %v219_v21 = vld [vmem:[%s1561_s21 + $0xf0] sm:$0xff] }
  0x1f   : > { %v220_v20 = vld [vmem:[%s1561_s21 + $0xf8] sm:$0xff]  ;;  %v223_v22 = vld [vmem:[%s1561_s21 + $0x110] sm:$0xff]  ;;  %v222_v23 = vld [vmem:[%s1561_s21 + $0x108] sm:$0xff] }
  0x20   : > { %v226_v24 = vld [vmem:[%s1561_s21 + $0x128] sm:$0xff]  ;;  %v225_v25 = vld [vmem:[%s1561_s21 + $0x120] sm:$0xff]  ;;  %v228_v27 = vld [vmem:[%s1561_s21 + $0x138] sm:$0xff] }
  0x21   : > { %415 = vxpose.xlu1.b32.cont [3/16] %v196_v4, 128  ;;  %383 = vxpose.xlu0.b32.cont [3/16] %v195_v5, 128  ;;  %v229_v26 = vld [vmem:[%s1561_s21 + $0x140] sm:$0xff]  ;;  %v232_v28 = vld [vmem:[%s1561_s21 + $0x158] sm:$0xff]  ;;  %v231_v29 = vld [vmem:[%s1561_s21 + $0x150] sm:$0xff] }
  0x22   : > { %v235_v30 = vld [vmem:[%s1561_s21 + $0x170] sm:$0xff]  ;;  %v234_v31 = vld [vmem:[%s1561_s21 + $0x168] sm:$0xff]  ;;  %v237_v32 = vld [vmem:[%s1561_s21 + $0x180] sm:$0xff] }
  0x23   : > { %v191_v33 = vld [vmem:[%s1561_s21 + $0x10] sm:$0xff]  ;;  %v240_v34 = vld [vmem:[%s1561_s21 + $0x198] sm:$0xff]  ;;  %v194_v35 = vld [vmem:[%s1561_s21 + $0x28] sm:$0xff] }
  0x24   : > { %v243_v36 = vld [vmem:[%s1561_s21 + $0x1b0] sm:$0xff]  ;;  %v197_v37 = vld [vmem:[%s1561_s21 + $0x40] sm:$0xff]  ;;  %v246_v38 = vld [vmem:[%s1561_s21 + $0x1c8] sm:$0xff] }
  0x25   : > { %416 = vxpose.xlu1.b32.cont [4/16] %v199_v6, 128  ;;  %384 = vxpose.xlu0.b32.cont [4/16] %v198_v7, 128  ;;  %v200_v39 = vld [vmem:[%s1561_s21 + $0x58] sm:$0xff]  ;;  %v249_v40 = vld [vmem:[%s1561_s21 + $0x1e0] sm:$0xff]  ;;  %v203_v41 = vld [vmem:[%s1561_s21 + $0x70] sm:$0xff] }
  0x26   : > { %v252_v42 = vld [vmem:[%s1561_s21 + $0x1f8] sm:$0xff]  ;;  %v206_v43 = vld [vmem:[%s1561_s21 + $0x88] sm:$0xff]  ;;  %v255_v44 = vld [vmem:[%s1561_s21 + $0x210] sm:$0xff] }
  0x27   : > { %v209_v45 = vld [vmem:[%s1561_s21 + $0xa0] sm:$0xff]  ;;  %v258_v46 = vld [vmem:[%s1561_s21 + $0x228] sm:$0xff]  ;;  %v212_v47 = vld [vmem:[%s1561_s21 + $0xb8] sm:$0xff] }
  0x28   : > { %v261_v48 = vld [vmem:[%s1561_s21 + $0x240] sm:$0xff]  ;;  %v215_v49 = vld [vmem:[%s1561_s21 + $0xd0] sm:$0xff]  ;;  %v264_v50 = vld [vmem:[%s1561_s21 + $0x258] sm:$0xff] }
  0x29   : > { %417 = vxpose.xlu1.b32.cont [5/16] %v202_v8, 128  ;;  %385 = vxpose.xlu0.b32.cont [5/16] %v201_v9, 128  ;;  %v218_v51 = vld [vmem:[%s1561_s21 + $0xe8] sm:$0xff]  ;;  %v267_v52 = vld [vmem:[%s1561_s21 + $0x270] sm:$0xff]  ;;  %v221_v53 = vld [vmem:[%s1561_s21 + $0x100] sm:$0xff] }
  0x2a   : > { %v270_v54 = vld [vmem:[%s1561_s21 + $0x288] sm:$0xff]  ;;  %v224_v55 = vld [vmem:[%s1561_s21 + $0x118] sm:$0xff]  ;;  %v273_v56 = vld [vmem:[%s1561_s21 + $0x2a0] sm:$0xff] }
  0x2b   : > { %v227_v57 = vld [vmem:[%s1561_s21 + $0x130] sm:$0xff]  ;;  %v276_v58 = vld [vmem:[%s1561_s21 + $0x2b8] sm:$0xff]  ;;  %v230_v59 = vld [vmem:[%s1561_s21 + $0x148] sm:$0xff] }
  0x2c   : > { %v279_v60 = vld [vmem:[%s1561_s21 + $0x2d0] sm:$0xff]  ;;  %v233_v61 = vld [vmem:[%s1561_s21 + $0x160] sm:$0xff]  ;;  %v282_v62 = vld [vmem:[%s1561_s21 + $0x2e8] sm:$0xff] }
  0x2d   : > { %418 = vxpose.xlu1.b32.cont [6/16] %v205_v10, 128  ;;  %386 = vxpose.xlu0.b32.cont [6/16] %v204_v11, 128  ;;  %v236_v63 = vld [vmem:[%s1561_s21 + $0x178] sm:$0xff]  ;;  %v239_v0 = vld [vmem:[%s1561_s21 + $0x190] sm:$0xff]  ;;  %v238_v1 = vld [vmem:[%s1561_s21 + $0x188] sm:$0xff] }
  0x2e   : > { %v242_v4 = vld [vmem:[%s1561_s21 + $0x1a8] sm:$0xff]  ;;  %v241_v5 = vld [vmem:[%s1561_s21 + $0x1a0] sm:$0xff]  ;;  %v244_v9 = vld [vmem:[%s1561_s21 + $0x1b8] sm:$0xff] }
  0x2f   : > { %v245_v8 = vld [vmem:[%s1561_s21 + $0x1c0] sm:$0xff] }
  0x31   : > { %419 = vxpose.xlu1.b32.cont [7/16] %v208_v12, 128  ;;  %387 = vxpose.xlu0.b32.cont [7/16] %v207_v13, 128  ;;  %v248_v12 = vld [vmem:[%s1561_s21 + $0x1d8] sm:$0xff]  ;;  %v247_v13 = vld [vmem:[%s1561_s21 + $0x1d0] sm:$0xff] }
  0x35   : > { %420 = vxpose.xlu1.b32.cont [8/16] %v211_v14, 128  ;;  %388 = vxpose.xlu0.b32.cont [8/16] %v210_v15, 128 }
  0x39   : > { %421 = vxpose.xlu1.b32.cont [9/16] %v214_v16, 128  ;;  %389 = vxpose.xlu0.b32.cont [9/16] %v213_v17, 128  ;;  %v251_v16 = vld [vmem:[%s1561_s21 + $0x1f0] sm:$0xff]  ;;  %v250_v17 = vld [vmem:[%s1561_s21 + $0x1e8] sm:$0xff] }
  0x3d   : > { %422 = vxpose.xlu1.b32.cont [10/16] %v217_v18, 128  ;;  %390 = vxpose.xlu0.b32.cont [10/16] %v216_v19, 128 }
  0x41   : > { %423 = vxpose.xlu1.b32.cont [11/16] %v220_v20, 128  ;;  %391 = vxpose.xlu0.b32.cont [11/16] %v219_v21, 128  ;;  %v254_v20 = vld [vmem:[%s1561_s21 + $0x208] sm:$0xff]  ;;  %v253_v21 = vld [vmem:[%s1561_s21 + $0x200] sm:$0xff] }
  0x45   : > { %424 = vxpose.xlu1.b32.cont [12/16] %v223_v22, 128  ;;  %392 = vxpose.xlu0.b32.cont [12/16] %v222_v23, 128 }
  0x49   : > { %425 = vxpose.xlu1.b32.cont [13/16] %v226_v24, 128  ;;  %393 = vxpose.xlu0.b32.cont [13/16] %v225_v25, 128  ;;  %v257_v24 = vld [vmem:[%s1561_s21 + $0x220] sm:$0xff]  ;;  %v256_v25 = vld [vmem:[%s1561_s21 + $0x218] sm:$0xff] }
  0x4d   : > { %426 = vxpose.xlu1.b32.cont [14/16] %v229_v26, 128  ;;  %394 = vxpose.xlu0.b32.cont [14/16] %v228_v27, 128 }
  0x51   : > { %427 = vxpose.xlu1.b32.cont [15/16] %v232_v28, 128  ;;  %395 = vxpose.xlu0.b32.cont [15/16] %v231_v29, 128  ;;  %v260_v28 = vld [vmem:[%s1561_s21 + $0x238] sm:$0xff]  ;;  %v259_v29 = vld [vmem:[%s1561_s21 + $0x230] sm:$0xff] }
  0x55   : > { %428 = vxpose.xlu1.b32.end [16/16] %v235_v30, 128  ;;  %396 = vxpose.xlu0.b32.end [16/16] %v234_v31, 128 }
  0x59   : > { %477 = vxpose.xlu1.b32.start [1/16] %v237_v32, 128  ;;  %445 = vxpose.xlu0.b32.start [1/16] %v191_v33, 128  ;;  %v263_v32 = vld [vmem:[%s1561_s21 + $0x250] sm:$0xff]  ;;  %v262_v33 = vld [vmem:[%s1561_s21 + $0x248] sm:$0xff] }
  0x5d   : > { %478 = vxpose.xlu1.b32.cont [2/16] %v240_v34, 128  ;;  %446 = vxpose.xlu0.b32.cont [2/16] %v194_v35, 128 }
  0x61   : > { %479 = vxpose.xlu1.b32.cont [3/16] %v243_v36, 128  ;;  %447 = vxpose.xlu0.b32.cont [3/16] %v197_v37, 128  ;;  %v266_v36 = vld [vmem:[%s1561_s21 + $0x268] sm:$0xff]  ;;  %v265_v37 = vld [vmem:[%s1561_s21 + $0x260] sm:$0xff] }
  0x65   : > { %480 = vxpose.xlu1.b32.cont [4/16] %v246_v38, 128  ;;  %448 = vxpose.xlu0.b32.cont [4/16] %v200_v39, 128 }
  0x69   : > { %481 = vxpose.xlu1.b32.cont [5/16] %v249_v40, 128  ;;  %449 = vxpose.xlu0.b32.cont [5/16] %v203_v41, 128  ;;  %v269_v40 = vld [vmem:[%s1561_s21 + $0x280] sm:$0xff]  ;;  %v268_v41 = vld [vmem:[%s1561_s21 + $0x278] sm:$0xff] }
  0x6d   : > { %482 = vxpose.xlu1.b32.cont [6/16] %v252_v42, 128  ;;  %450 = vxpose.xlu0.b32.cont [6/16] %v206_v43, 128 }
  0x71   : > { %483 = vxpose.xlu1.b32.cont [7/16] %v255_v44, 128  ;;  %451 = vxpose.xlu0.b32.cont [7/16] %v209_v45, 128  ;;  %v272_v44 = vld [vmem:[%s1561_s21 + $0x298] sm:$0xff]  ;;  %v271_v45 = vld [vmem:[%s1561_s21 + $0x290] sm:$0xff] }
  0x75   : > { %484 = vxpose.xlu1.b32.cont [8/16] %v258_v46, 128  ;;  %452 = vxpose.xlu0.b32.cont [8/16] %v212_v47, 128 }
  0x79   : > { %485 = vxpose.xlu1.b32.cont [9/16] %v261_v48, 128  ;;  %453 = vxpose.xlu0.b32.cont [9/16] %v215_v49, 128  ;;  %v275_v48 = vld [vmem:[%s1561_s21 + $0x2b0] sm:$0xff]  ;;  %v274_v49 = vld [vmem:[%s1561_s21 + $0x2a8] sm:$0xff] }
  0x7d   : > { %486 = vxpose.xlu1.b32.cont [10/16] %v264_v50, 128  ;;  %454 = vxpose.xlu0.b32.cont [10/16] %v218_v51, 128 }
  0x81   : > { %487 = vxpose.xlu1.b32.cont [11/16] %v267_v52, 128  ;;  %455 = vxpose.xlu0.b32.cont [11/16] %v221_v53, 128  ;;  %v278_v52 = vld [vmem:[%s1561_s21 + $0x2c8] sm:$0xff]  ;;  %v277_v53 = vld [vmem:[%s1561_s21 + $0x2c0] sm:$0xff] }
  0x85   : > { %488 = vxpose.xlu1.b32.cont [12/16] %v270_v54, 128  ;;  %456 = vxpose.xlu0.b32.cont [12/16] %v224_v55, 128 }
  0x89   : > { %489 = vxpose.xlu1.b32.cont [13/16] %v273_v56, 128  ;;  %457 = vxpose.xlu0.b32.cont [13/16] %v227_v57, 128  ;;  %v281_v56 = vld [vmem:[%s1561_s21 + $0x2e0] sm:$0xff]  ;;  %v280_v57 = vld [vmem:[%s1561_s21 + $0x2d8] sm:$0xff] }
  0x8d   : > { %490 = vxpose.xlu1.b32.cont [14/16] %v276_v58, 128  ;;  %458 = vxpose.xlu0.b32.cont [14/16] %v230_v59, 128 }
  0x91   : > { %491 = vxpose.xlu1.b32.cont [15/16] %v279_v60, 128  ;;  %459 = vxpose.xlu0.b32.cont [15/16] %v233_v61, 128  ;;  %v284_v60 = vld [vmem:[%s1561_s21 + $0x2f8] sm:$0xff]  ;;  %v283_v61 = vld [vmem:[%s1561_s21 + $0x2f0] sm:$0xff] }
  0x95   : > { %492 = vxpose.xlu1.b32.end [16/16] %v282_v62, 128  ;;  %460 = vxpose.xlu0.b32.end [16/16] %v236_v63, 128 }
  0x99   : > { %541 = vxpose.xlu1.b32.start [1/16] %v239_v0, 128  ;;  %v429_v2 = vpop.trf.xlu1  ;;  %509 = vxpose.xlu0.b32.start [1/16] %v238_v1, 128  ;;  %v397_v3 = vpop.trf.xlu0  ;;  %v286_v0 = vld [vmem:[%s1561_s21 + $0x308] sm:$0xff]  ;;  %v285_v1 = vld [vmem:[%s1561_s21 + $0x300] sm:$0xff] }
  0x9a   : > { %829 = vst [vmem:[%s1630_s24 + $0x200] sm:$0xff] %v429_v2  ;;  %765 = vst [vmem:[%s1630_s24] sm:$0xff] %v397_v3 }
  0x9d   : > { %542 = vxpose.xlu1.b32.cont [2/16] %v242_v4, 128  ;;  %v430_v6 = vpop.trf.xlu1  ;;  %510 = vxpose.xlu0.b32.cont [2/16] %v241_v5, 128  ;;  %v398_v7 = vpop.trf.xlu0  ;;  %v289_v4 = vld [vmem:[%s1561_s21 + $0x320] sm:$0xff]  ;;  %v288_v5 = vld [vmem:[%s1561_s21 + $0x318] sm:$0xff] }
  0x9e   : > { %833 = vst [vmem:[%s1630_s24 + $0x220] sm:$0xff] %v430_v6  ;;  %769 = vst [vmem:[%s1630_s24 + $0x20] sm:$0xff] %v398_v7 }
  0xa1   : > { %543 = vxpose.xlu1.b32.cont [3/16] %v245_v8, 128  ;;  %v431_v10 = vpop.trf.xlu1  ;;  %511 = vxpose.xlu0.b32.cont [3/16] %v244_v9, 128  ;;  %v399_v11 = vpop.trf.xlu0  ;;  %v292_v8 = vld [vmem:[%s1561_s21 + $0x338] sm:$0xff]  ;;  %v291_v9 = vld [vmem:[%s1561_s21 + $0x330] sm:$0xff] }
  0xa2   : > { %837 = vst [vmem:[%s1630_s24 + $0x240] sm:$0xff] %v431_v10  ;;  %773 = vst [vmem:[%s1630_s24 + $0x40] sm:$0xff] %v399_v11 }
  0xa5   : > { %544 = vxpose.xlu1.b32.cont [4/16] %v248_v12, 128  ;;  %v432_v14 = vpop.trf.xlu1  ;;  %512 = vxpose.xlu0.b32.cont [4/16] %v247_v13, 128  ;;  %v400_v15 = vpop.trf.xlu0  ;;  %v295_v12 = vld [vmem:[%s1561_s21 + $0x350] sm:$0xff]  ;;  %v294_v13 = vld [vmem:[%s1561_s21 + $0x348] sm:$0xff] }
  0xa6   : > { %841 = vst [vmem:[%s1630_s24 + $0x260] sm:$0xff] %v432_v14  ;;  %777 = vst [vmem:[%s1630_s24 + $0x60] sm:$0xff] %v400_v15 }
  0xa9   : > { %545 = vxpose.xlu1.b32.cont [5/16] %v251_v16, 128  ;;  %v433_v18 = vpop.trf.xlu1  ;;  %513 = vxpose.xlu0.b32.cont [5/16] %v250_v17, 128  ;;  %v401_v19 = vpop.trf.xlu0  ;;  %v298_v16 = vld [vmem:[%s1561_s21 + $0x368] sm:$0xff]  ;;  %v297_v17 = vld [vmem:[%s1561_s21 + $0x360] sm:$0xff] }
  0xaa   : > { %845 = vst [vmem:[%s1630_s24 + $0x280] sm:$0xff] %v433_v18  ;;  %781 = vst [vmem:[%s1630_s24 + $0x80] sm:$0xff] %v401_v19 }
  0xad   : > { %546 = vxpose.xlu1.b32.cont [6/16] %v254_v20, 128  ;;  %v434_v22 = vpop.trf.xlu1  ;;  %514 = vxpose.xlu0.b32.cont [6/16] %v253_v21, 128  ;;  %v402_v23 = vpop.trf.xlu0  ;;  %v301_v20 = vld [vmem:[%s1561_s21 + $0x380] sm:$0xff]  ;;  %v300_v21 = vld [vmem:[%s1561_s21 + $0x378] sm:$0xff] }
  0xae   : > { %849 = vst [vmem:[%s1630_s24 + $0x2a0] sm:$0xff] %v434_v22  ;;  %785 = vst [vmem:[%s1630_s24 + $0xa0] sm:$0xff] %v402_v23 }
  0xb1   : > { %547 = vxpose.xlu1.b32.cont [7/16] %v257_v24, 128  ;;  %v435_v26 = vpop.trf.xlu1  ;;  %515 = vxpose.xlu0.b32.cont [7/16] %v256_v25, 128  ;;  %v403_v27 = vpop.trf.xlu0  ;;  %v304_v24 = vld [vmem:[%s1561_s21 + $0x398] sm:$0xff]  ;;  %v303_v25 = vld [vmem:[%s1561_s21 + $0x390] sm:$0xff] }
  0xb2   : > { %853 = vst [vmem:[%s1630_s24 + $0x2c0] sm:$0xff] %v435_v26  ;;  %789 = vst [vmem:[%s1630_s24 + $0xc0] sm:$0xff] %v403_v27 }
  0xb5   : > { %548 = vxpose.xlu1.b32.cont [8/16] %v260_v28, 128  ;;  %v436_v30 = vpop.trf.xlu1  ;;  %516 = vxpose.xlu0.b32.cont [8/16] %v259_v29, 128  ;;  %v404_v31 = vpop.trf.xlu0  ;;  %v307_v28 = vld [vmem:[%s1561_s21 + $0x3b0] sm:$0xff]  ;;  %v306_v29 = vld [vmem:[%s1561_s21 + $0x3a8] sm:$0xff] }
  0xb6   : > { %857 = vst [vmem:[%s1630_s24 + $0x2e0] sm:$0xff] %v436_v30  ;;  %793 = vst [vmem:[%s1630_s24 + $0xe0] sm:$0xff] %v404_v31 }
  0xb9   : > { %549 = vxpose.xlu1.b32.cont [9/16] %v263_v32, 128  ;;  %v437_v34 = vpop.trf.xlu1  ;;  %517 = vxpose.xlu0.b32.cont [9/16] %v262_v33, 128  ;;  %v405_v35 = vpop.trf.xlu0  ;;  %v310_v32 = vld [vmem:[%s1561_s21 + $0x3c8] sm:$0xff]  ;;  %v309_v33 = vld [vmem:[%s1561_s21 + $0x3c0] sm:$0xff] }
  0xba   : > { %861 = vst [vmem:[%s1630_s24 + $0x300] sm:$0xff] %v437_v34  ;;  %797 = vst [vmem:[%s1630_s24 + $0x100] sm:$0xff] %v405_v35 }
  0xbd   : > { %550 = vxpose.xlu1.b32.cont [10/16] %v266_v36, 128  ;;  %v438_v38 = vpop.trf.xlu1  ;;  %518 = vxpose.xlu0.b32.cont [10/16] %v265_v37, 128  ;;  %v406_v39 = vpop.trf.xlu0  ;;  %v313_v36 = vld [vmem:[%s1561_s21 + $0x3e0] sm:$0xff]  ;;  %v312_v37 = vld [vmem:[%s1561_s21 + $0x3d8] sm:$0xff] }
  0xbe   : > { %865 = vst [vmem:[%s1630_s24 + $0x320] sm:$0xff] %v438_v38  ;;  %801 = vst [vmem:[%s1630_s24 + $0x120] sm:$0xff] %v406_v39 }
  0xc1   : > { %551 = vxpose.xlu1.b32.cont [11/16] %v269_v40, 128  ;;  %v439_v42 = vpop.trf.xlu1  ;;  %519 = vxpose.xlu0.b32.cont [11/16] %v268_v41, 128  ;;  %v407_v43 = vpop.trf.xlu0  ;;  %v316_v40 = vld [vmem:[%s1561_s21 + $0x3f8] sm:$0xff]  ;;  %v315_v41 = vld [vmem:[%s1561_s21 + $0x3f0] sm:$0xff] }
  0xc2   : > { %869 = vst [vmem:[%s1630_s24 + $0x340] sm:$0xff] %v439_v42  ;;  %805 = vst [vmem:[%s1630_s24 + $0x140] sm:$0xff] %v407_v43 }
  0xc5   : > { %552 = vxpose.xlu1.b32.cont [12/16] %v272_v44, 128  ;;  %v440_v46 = vpop.trf.xlu1  ;;  %520 = vxpose.xlu0.b32.cont [12/16] %v271_v45, 128  ;;  %v408_v47 = vpop.trf.xlu0  ;;  %v319_v44 = vld [vmem:[%s1561_s21 + $0x410] sm:$0xff]  ;;  %v318_v45 = vld [vmem:[%s1561_s21 + $0x408] sm:$0xff] }
  0xc6   : > { %873 = vst [vmem:[%s1630_s24 + $0x360] sm:$0xff] %v440_v46  ;;  %809 = vst [vmem:[%s1630_s24 + $0x160] sm:$0xff] %v408_v47 }
  0xc9   : > { %553 = vxpose.xlu1.b32.cont [13/16] %v275_v48, 128  ;;  %v441_v50 = vpop.trf.xlu1  ;;  %521 = vxpose.xlu0.b32.cont [13/16] %v274_v49, 128  ;;  %v409_v51 = vpop.trf.xlu0  ;;  %v322_v48 = vld [vmem:[%s1561_s21 + $0x428] sm:$0xff]  ;;  %v321_v49 = vld [vmem:[%s1561_s21 + $0x420] sm:$0xff] }
  0xca   : > { %877 = vst [vmem:[%s1630_s24 + $0x380] sm:$0xff] %v441_v50  ;;  %813 = vst [vmem:[%s1630_s24 + $0x180] sm:$0xff] %v409_v51 }
  0xcd   : > { %554 = vxpose.xlu1.b32.cont [14/16] %v278_v52, 128  ;;  %v442_v54 = vpop.trf.xlu1  ;;  %522 = vxpose.xlu0.b32.cont [14/16] %v277_v53, 128  ;;  %v410_v55 = vpop.trf.xlu0  ;;  %v325_v52 = vld [vmem:[%s1561_s21 + $0x440] sm:$0xff]  ;;  %v324_v53 = vld [vmem:[%s1561_s21 + $0x438] sm:$0xff] }
  0xce   : > { %881 = vst [vmem:[%s1630_s24 + $0x3a0] sm:$0xff] %v442_v54  ;;  %817 = vst [vmem:[%s1630_s24 + $0x1a0] sm:$0xff] %v410_v55 }
  0xd1   : > { %555 = vxpose.xlu1.b32.cont [15/16] %v281_v56, 128  ;;  %v443_v58 = vpop.trf.xlu1  ;;  %523 = vxpose.xlu0.b32.cont [15/16] %v280_v57, 128  ;;  %v411_v59 = vpop.trf.xlu0  ;;  %v328_v56 = vld [vmem:[%s1561_s21 + $0x458] sm:$0xff]  ;;  %v327_v57 = vld [vmem:[%s1561_s21 + $0x450] sm:$0xff] }
  0xd2   : > { %885 = vst [vmem:[%s1630_s24 + $0x3c0] sm:$0xff] %v443_v58  ;;  %821 = vst [vmem:[%s1630_s24 + $0x1c0] sm:$0xff] %v411_v59 }
  0xd5   : > { %556 = vxpose.xlu1.b32.end [16/16] %v284_v60, 128  ;;  %v444_v62 = vpop.trf.xlu1  ;;  %524 = vxpose.xlu0.b32.end [16/16] %v283_v61, 128  ;;  %v412_v63 = vpop.trf.xlu0  ;;  %v331_v60 = vld [vmem:[%s1561_s21 + $0x470] sm:$0xff]  ;;  %v330_v61 = vld [vmem:[%s1561_s21 + $0x468] sm:$0xff] }
  0xd6   : > { %889 = vst [vmem:[%s1630_s24 + $0x3e0] sm:$0xff] %v444_v62  ;;  %825 = vst [vmem:[%s1630_s24 + $0x1e0] sm:$0xff] %v412_v63 }
  0xd9   : > { %605 = vxpose.xlu1.b32.start [1/16] %v286_v0, 128  ;;  %v493_v2 = vpop.trf.xlu1  ;;  %573 = vxpose.xlu0.b32.start [1/16] %v285_v1, 128  ;;  %v461_v3 = vpop.trf.xlu0  ;;  %v333_v0 = vld [vmem:[%s1561_s21 + $0x480] sm:$0xff]  ;;  %v287_v1 = vld [vmem:[%s1561_s21 + $0x310] sm:$0xff] }
  0xda   : > { %766 = vst [vmem:[%s1630_s24 + $0x8] sm:$0xff] %v493_v2  ;;  %893 = vst [vmem:[%s1630_s24 + $0x400] sm:$0xff] %v461_v3 }
  0xdd   : > { %606 = vxpose.xlu1.b32.cont [2/16] %v289_v4, 128  ;;  %v494_v6 = vpop.trf.xlu1  ;;  %574 = vxpose.xlu0.b32.cont [2/16] %v288_v5, 128  ;;  %v462_v7 = vpop.trf.xlu0  ;;  %v336_v4 = vld [vmem:[%s1561_s21 + $0x498] sm:$0xff]  ;;  %v290_v5 = vld [vmem:[%s1561_s21 + $0x328] sm:$0xff] }
  0xde   : > { %770 = vst [vmem:[%s1630_s24 + $0x28] sm:$0xff] %v494_v6  ;;  %897 = vst [vmem:[%s1630_s24 + $0x420] sm:$0xff] %v462_v7 }
  0xe1   : > { %607 = vxpose.xlu1.b32.cont [3/16] %v292_v8, 128  ;;  %v495_v10 = vpop.trf.xlu1  ;;  %575 = vxpose.xlu0.b32.cont [3/16] %v291_v9, 128  ;;  %v463_v11 = vpop.trf.xlu0  ;;  %v339_v8 = vld [vmem:[%s1561_s21 + $0x4b0] sm:$0xff]  ;;  %v293_v9 = vld [vmem:[%s1561_s21 + $0x340] sm:$0xff] }
  0xe2   : > { %774 = vst [vmem:[%s1630_s24 + $0x48] sm:$0xff] %v495_v10  ;;  %901 = vst [vmem:[%s1630_s24 + $0x440] sm:$0xff] %v463_v11 }
  0xe5   : > { %608 = vxpose.xlu1.b32.cont [4/16] %v295_v12, 128  ;;  %v496_v14 = vpop.trf.xlu1  ;;  %576 = vxpose.xlu0.b32.cont [4/16] %v294_v13, 128  ;;  %v464_v15 = vpop.trf.xlu0  ;;  %v342_v12 = vld [vmem:[%s1561_s21 + $0x4c8] sm:$0xff]  ;;  %v296_v13 = vld [vmem:[%s1561_s21 + $0x358] sm:$0xff] }
  0xe6   : > { %778 = vst [vmem:[%s1630_s24 + $0x68] sm:$0xff] %v496_v14  ;;  %905 = vst [vmem:[%s1630_s24 + $0x460] sm:$0xff] %v464_v15 }
  0xe9   : > { %609 = vxpose.xlu1.b32.cont [5/16] %v298_v16, 128  ;;  %v497_v18 = vpop.trf.xlu1  ;;  %577 = vxpose.xlu0.b32.cont [5/16] %v297_v17, 128  ;;  %v465_v19 = vpop.trf.xlu0  ;;  %v345_v16 = vld [vmem:[%s1561_s21 + $0x4e0] sm:$0xff]  ;;  %v299_v17 = vld [vmem:[%s1561_s21 + $0x370] sm:$0xff] }
  0xea   : > { %782 = vst [vmem:[%s1630_s24 + $0x88] sm:$0xff] %v497_v18  ;;  %909 = vst [vmem:[%s1630_s24 + $0x480] sm:$0xff] %v465_v19 }
  0xed   : > { %610 = vxpose.xlu1.b32.cont [6/16] %v301_v20, 128  ;;  %v498_v22 = vpop.trf.xlu1  ;;  %578 = vxpose.xlu0.b32.cont [6/16] %v300_v21, 128  ;;  %v466_v23 = vpop.trf.xlu0  ;;  %v348_v20 = vld [vmem:[%s1561_s21 + $0x4f8] sm:$0xff]  ;;  %v302_v21 = vld [vmem:[%s1561_s21 + $0x388] sm:$0xff] }
  0xee   : > { %786 = vst [vmem:[%s1630_s24 + $0xa8] sm:$0xff] %v498_v22  ;;  %913 = vst [vmem:[%s1630_s24 + $0x4a0] sm:$0xff] %v466_v23 }
  0xf1   : > { %611 = vxpose.xlu1.b32.cont [7/16] %v304_v24, 128  ;;  %v499_v26 = vpop.trf.xlu1  ;;  %579 = vxpose.xlu0.b32.cont [7/16] %v303_v25, 128  ;;  %v467_v27 = vpop.trf.xlu0  ;;  %v351_v24 = vld [vmem:[%s1561_s21 + $0x510] sm:$0xff]  ;;  %v305_v25 = vld [vmem:[%s1561_s21 + $0x3a0] sm:$0xff] }
  0xf2   : > { %790 = vst [vmem:[%s1630_s24 + $0xc8] sm:$0xff] %v499_v26  ;;  %917 = vst [vmem:[%s1630_s24 + $0x4c0] sm:$0xff] %v467_v27 }
  0xf5   : > { %612 = vxpose.xlu1.b32.cont [8/16] %v307_v28, 128  ;;  %v500_v30 = vpop.trf.xlu1  ;;  %580 = vxpose.xlu0.b32.cont [8/16] %v306_v29, 128  ;;  %v468_v31 = vpop.trf.xlu0  ;;  %v354_v28 = vld [vmem:[%s1561_s21 + $0x528] sm:$0xff]  ;;  %v308_v29 = vld [vmem:[%s1561_s21 + $0x3b8] sm:$0xff] }
  0xf6   : > { %794 = vst [vmem:[%s1630_s24 + $0xe8] sm:$0xff] %v500_v30  ;;  %921 = vst [vmem:[%s1630_s24 + $0x4e0] sm:$0xff] %v468_v31 }
  0xf9   : > { %613 = vxpose.xlu1.b32.cont [9/16] %v310_v32, 128  ;;  %v501_v34 = vpop.trf.xlu1  ;;  %581 = vxpose.xlu0.b32.cont [9/16] %v309_v33, 128  ;;  %v469_v35 = vpop.trf.xlu0  ;;  %v357_v32 = vld [vmem:[%s1561_s21 + $0x540] sm:$0xff]  ;;  %v311_v33 = vld [vmem:[%s1561_s21 + $0x3d0] sm:$0xff] }
  0xfa   : > { %798 = vst [vmem:[%s1630_s24 + $0x108] sm:$0xff] %v501_v34  ;;  %925 = vst [vmem:[%s1630_s24 + $0x500] sm:$0xff] %v469_v35 }
  0xfd   : > { %614 = vxpose.xlu1.b32.cont [10/16] %v313_v36, 128  ;;  %v502_v38 = vpop.trf.xlu1  ;;  %582 = vxpose.xlu0.b32.cont [10/16] %v312_v37, 128  ;;  %v470_v39 = vpop.trf.xlu0  ;;  %v360_v36 = vld [vmem:[%s1561_s21 + $0x558] sm:$0xff]  ;;  %v314_v37 = vld [vmem:[%s1561_s21 + $0x3e8] sm:$0xff] }
  0xfe   : > { %802 = vst [vmem:[%s1630_s24 + $0x128] sm:$0xff] %v502_v38  ;;  %929 = vst [vmem:[%s1630_s24 + $0x520] sm:$0xff] %v470_v39 }
 0x101   : > { %615 = vxpose.xlu1.b32.cont [11/16] %v316_v40, 128  ;;  %v503_v42 = vpop.trf.xlu1  ;;  %583 = vxpose.xlu0.b32.cont [11/16] %v315_v41, 128  ;;  %v471_v43 = vpop.trf.xlu0  ;;  %v363_v40 = vld [vmem:[%s1561_s21 + $0x570] sm:$0xff]  ;;  %v317_v41 = vld [vmem:[%s1561_s21 + $0x400] sm:$0xff] }
 0x102   : > { %806 = vst [vmem:[%s1630_s24 + $0x148] sm:$0xff] %v503_v42  ;;  %933 = vst [vmem:[%s1630_s24 + $0x540] sm:$0xff] %v471_v43 }
 0x105   : > { %616 = vxpose.xlu1.b32.cont [12/16] %v319_v44, 128  ;;  %v504_v46 = vpop.trf.xlu1  ;;  %584 = vxpose.xlu0.b32.cont [12/16] %v318_v45, 128  ;;  %v472_v47 = vpop.trf.xlu0  ;;  %v366_v44 = vld [vmem:[%s1561_s21 + $0x588] sm:$0xff]  ;;  %v320_v45 = vld [vmem:[%s1561_s21 + $0x418] sm:$0xff] }
 0x106   : > { %810 = vst [vmem:[%s1630_s24 + $0x168] sm:$0xff] %v504_v46  ;;  %937 = vst [vmem:[%s1630_s24 + $0x560] sm:$0xff] %v472_v47 }
 0x109   : > { %617 = vxpose.xlu1.b32.cont [13/16] %v322_v48, 128  ;;  %v505_v50 = vpop.trf.xlu1  ;;  %585 = vxpose.xlu0.b32.cont [13/16] %v321_v49, 128  ;;  %v473_v51 = vpop.trf.xlu0  ;;  %v369_v48 = vld [vmem:[%s1561_s21 + $0x5a0] sm:$0xff]  ;;  %v323_v49 = vld [vmem:[%s1561_s21 + $0x430] sm:$0xff] }
 0x10a   : > { %814 = vst [vmem:[%s1630_s24 + $0x188] sm:$0xff] %v505_v50  ;;  %941 = vst [vmem:[%s1630_s24 + $0x580] sm:$0xff] %v473_v51 }
 0x10d   : > { %618 = vxpose.xlu1.b32.cont [14/16] %v325_v52, 128  ;;  %v506_v54 = vpop.trf.xlu1  ;;  %586 = vxpose.xlu0.b32.cont [14/16] %v324_v53, 128  ;;  %v474_v55 = vpop.trf.xlu0  ;;  %v372_v52 = vld [vmem:[%s1561_s21 + $0x5b8] sm:$0xff]  ;;  %v326_v53 = vld [vmem:[%s1561_s21 + $0x448] sm:$0xff] }
 0x10e   : > { %818 = vst [vmem:[%s1630_s24 + $0x1a8] sm:$0xff] %v506_v54  ;;  %945 = vst [vmem:[%s1630_s24 + $0x5a0] sm:$0xff] %v474_v55 }
 0x111   : > { %619 = vxpose.xlu1.b32.cont [15/16] %v328_v56, 128  ;;  %v507_v58 = vpop.trf.xlu1  ;;  %587 = vxpose.xlu0.b32.cont [15/16] %v327_v57, 128  ;;  %v475_v59 = vpop.trf.xlu0  ;;  %v375_v56 = vld [vmem:[%s1561_s21 + $0x5d0] sm:$0xff]  ;;  %v329_v57 = vld [vmem:[%s1561_s21 + $0x460] sm:$0xff] }
 0x112   : > { %822 = vst [vmem:[%s1630_s24 + $0x1c8] sm:$0xff] %v507_v58  ;;  %949 = vst [vmem:[%s1630_s24 + $0x5c0] sm:$0xff] %v475_v59 }
 0x115   : > { %620 = vxpose.xlu1.b32.end [16/16] %v331_v60, 128  ;;  %v508_v62 = vpop.trf.xlu1  ;;  %588 = vxpose.xlu0.b32.end [16/16] %v330_v61, 128  ;;  %v476_v63 = vpop.trf.xlu0  ;;  %v378_v60 = vld [vmem:[%s1561_s21 + $0x5e8] sm:$0xff]  ;;  %v332_v61 = vld [vmem:[%s1561_s21 + $0x478] sm:$0xff] }
 0x116   : > { %826 = vst [vmem:[%s1630_s24 + $0x1e8] sm:$0xff] %v508_v62  ;;  %953 = vst [vmem:[%s1630_s24 + $0x5e0] sm:$0xff] %v476_v63 }
 0x119   : > { %669 = vxpose.xlu1.b32.start [1/16] %v333_v0, 128  ;;  %v557_v2 = vpop.trf.xlu1  ;;  %637 = vxpose.xlu0.b32.start [1/16] %v287_v1, 128  ;;  %v525_v3 = vpop.trf.xlu0  ;;  %v335_v0 = vld [vmem:[%s1561_s21 + $0x490] sm:$0xff]  ;;  %v334_v1 = vld [vmem:[%s1561_s21 + $0x488] sm:$0xff] }
 0x11a   : > { %894 = vst [vmem:[%s1630_s24 + $0x408] sm:$0xff] %v557_v2  ;;  %830 = vst [vmem:[%s1630_s24 + $0x208] sm:$0xff] %v525_v3 }
 0x11d   : > { %670 = vxpose.xlu1.b32.cont [2/16] %v336_v4, 128  ;;  %v558_v6 = vpop.trf.xlu1  ;;  %638 = vxpose.xlu0.b32.cont [2/16] %v290_v5, 128  ;;  %v526_v7 = vpop.trf.xlu0  ;;  %v338_v4 = vld [vmem:[%s1561_s21 + $0x4a8] sm:$0xff]  ;;  %v337_v5 = vld [vmem:[%s1561_s21 + $0x4a0] sm:$0xff] }
 0x11e   : > { %898 = vst [vmem:[%s1630_s24 + $0x428] sm:$0xff] %v558_v6  ;;  %834 = vst [vmem:[%s1630_s24 + $0x228] sm:$0xff] %v526_v7 }
 0x121   : > { %671 = vxpose.xlu1.b32.cont [3/16] %v339_v8, 128  ;;  %v559_v10 = vpop.trf.xlu1  ;;  %639 = vxpose.xlu0.b32.cont [3/16] %v293_v9, 128  ;;  %v527_v11 = vpop.trf.xlu0  ;;  %v341_v8 = vld [vmem:[%s1561_s21 + $0x4c0] sm:$0xff]  ;;  %v340_v9 = vld [vmem:[%s1561_s21 + $0x4b8] sm:$0xff] }
 0x122   : > { %902 = vst [vmem:[%s1630_s24 + $0x448] sm:$0xff] %v559_v10  ;;  %838 = vst [vmem:[%s1630_s24 + $0x248] sm:$0xff] %v527_v11 }
 0x125   : > { %672 = vxpose.xlu1.b32.cont [4/16] %v342_v12, 128  ;;  %v560_v14 = vpop.trf.xlu1  ;;  %640 = vxpose.xlu0.b32.cont [4/16] %v296_v13, 128  ;;  %v528_v15 = vpop.trf.xlu0  ;;  %v344_v12 = vld [vmem:[%s1561_s21 + $0x4d8] sm:$0xff]  ;;  %v343_v13 = vld [vmem:[%s1561_s21 + $0x4d0] sm:$0xff] }
 0x126   : > { %906 = vst [vmem:[%s1630_s24 + $0x468] sm:$0xff] %v560_v14  ;;  %842 = vst [vmem:[%s1630_s24 + $0x268] sm:$0xff] %v528_v15 }
 0x129   : > { %673 = vxpose.xlu1.b32.cont [5/16] %v345_v16, 128  ;;  %v561_v18 = vpop.trf.xlu1  ;;  %641 = vxpose.xlu0.b32.cont [5/16] %v299_v17, 128  ;;  %v529_v19 = vpop.trf.xlu0  ;;  %v347_v16 = vld [vmem:[%s1561_s21 + $0x4f0] sm:$0xff]  ;;  %v346_v17 = vld [vmem:[%s1561_s21 + $0x4e8] sm:$0xff] }
 0x12a   : > { %910 = vst [vmem:[%s1630_s24 + $0x488] sm:$0xff] %v561_v18  ;;  %846 = vst [vmem:[%s1630_s24 + $0x288] sm:$0xff] %v529_v19 }
 0x12d   : > { %674 = vxpose.xlu1.b32.cont [6/16] %v348_v20, 128  ;;  %v562_v22 = vpop.trf.xlu1  ;;  %642 = vxpose.xlu0.b32.cont [6/16] %v302_v21, 128  ;;  %v530_v23 = vpop.trf.xlu0  ;;  %v350_v20 = vld [vmem:[%s1561_s21 + $0x508] sm:$0xff]  ;;  %v349_v21 = vld [vmem:[%s1561_s21 + $0x500] sm:$0xff] }
 0x12e   : > { %914 = vst [vmem:[%s1630_s24 + $0x4a8] sm:$0xff] %v562_v22  ;;  %850 = vst [vmem:[%s1630_s24 + $0x2a8] sm:$0xff] %v530_v23 }
 0x131   : > { %675 = vxpose.xlu1.b32.cont [7/16] %v351_v24, 128  ;;  %v563_v26 = vpop.trf.xlu1  ;;  %643 = vxpose.xlu0.b32.cont [7/16] %v305_v25, 128  ;;  %v531_v27 = vpop.trf.xlu0  ;;  %v353_v24 = vld [vmem:[%s1561_s21 + $0x520] sm:$0xff]  ;;  %v352_v25 = vld [vmem:[%s1561_s21 + $0x518] sm:$0xff] }
 0x132   : > { %918 = vst [vmem:[%s1630_s24 + $0x4c8] sm:$0xff] %v563_v26  ;;  %854 = vst [vmem:[%s1630_s24 + $0x2c8] sm:$0xff] %v531_v27 }
 0x135   : > { %676 = vxpose.xlu1.b32.cont [8/16] %v354_v28, 128  ;;  %v564_v30 = vpop.trf.xlu1  ;;  %644 = vxpose.xlu0.b32.cont [8/16] %v308_v29, 128  ;;  %v532_v31 = vpop.trf.xlu0  ;;  %v356_v28 = vld [vmem:[%s1561_s21 + $0x538] sm:$0xff]  ;;  %v355_v29 = vld [vmem:[%s1561_s21 + $0x530] sm:$0xff] }
 0x136   : > { %922 = vst [vmem:[%s1630_s24 + $0x4e8] sm:$0xff] %v564_v30  ;;  %858 = vst [vmem:[%s1630_s24 + $0x2e8] sm:$0xff] %v532_v31 }
 0x139   : > { %677 = vxpose.xlu1.b32.cont [9/16] %v357_v32, 128  ;;  %v565_v34 = vpop.trf.xlu1  ;;  %645 = vxpose.xlu0.b32.cont [9/16] %v311_v33, 128  ;;  %v533_v35 = vpop.trf.xlu0  ;;  %v359_v32 = vld [vmem:[%s1561_s21 + $0x550] sm:$0xff]  ;;  %v358_v33 = vld [vmem:[%s1561_s21 + $0x548] sm:$0xff] }
 0x13a   : > { %926 = vst [vmem:[%s1630_s24 + $0x508] sm:$0xff] %v565_v34  ;;  %862 = vst [vmem:[%s1630_s24 + $0x308] sm:$0xff] %v533_v35 }
 0x13d   : > { %678 = vxpose.xlu1.b32.cont [10/16] %v360_v36, 128  ;;  %v566_v38 = vpop.trf.xlu1  ;;  %646 = vxpose.xlu0.b32.cont [10/16] %v314_v37, 128  ;;  %v534_v39 = vpop.trf.xlu0  ;;  %v362_v36 = vld [vmem:[%s1561_s21 + $0x568] sm:$0xff]  ;;  %v361_v37 = vld [vmem:[%s1561_s21 + $0x560] sm:$0xff] }
 0x13e   : > { %930 = vst [vmem:[%s1630_s24 + $0x528] sm:$0xff] %v566_v38  ;;  %866 = vst [vmem:[%s1630_s24 + $0x328] sm:$0xff] %v534_v39 }
 0x141   : > { %679 = vxpose.xlu1.b32.cont [11/16] %v363_v40, 128  ;;  %v567_v42 = vpop.trf.xlu1  ;;  %647 = vxpose.xlu0.b32.cont [11/16] %v317_v41, 128  ;;  %v535_v43 = vpop.trf.xlu0  ;;  %v365_v40 = vld [vmem:[%s1561_s21 + $0x580] sm:$0xff]  ;;  %v364_v41 = vld [vmem:[%s1561_s21 + $0x578] sm:$0xff] }
 0x142   : > { %934 = vst [vmem:[%s1630_s24 + $0x548] sm:$0xff] %v567_v42  ;;  %870 = vst [vmem:[%s1630_s24 + $0x348] sm:$0xff] %v535_v43 }
 0x145   : > { %680 = vxpose.xlu1.b32.cont [12/16] %v366_v44, 128  ;;  %v568_v46 = vpop.trf.xlu1  ;;  %648 = vxpose.xlu0.b32.cont [12/16] %v320_v45, 128  ;;  %v536_v47 = vpop.trf.xlu0  ;;  %v368_v44 = vld [vmem:[%s1561_s21 + $0x598] sm:$0xff]  ;;  %v367_v45 = vld [vmem:[%s1561_s21 + $0x590] sm:$0xff] }
 0x146   : > { %938 = vst [vmem:[%s1630_s24 + $0x568] sm:$0xff] %v568_v46  ;;  %874 = vst [vmem:[%s1630_s24 + $0x368] sm:$0xff] %v536_v47 }
 0x149   : > { %681 = vxpose.xlu1.b32.cont [13/16] %v369_v48, 128  ;;  %v569_v50 = vpop.trf.xlu1  ;;  %649 = vxpose.xlu0.b32.cont [13/16] %v323_v49, 128  ;;  %v537_v51 = vpop.trf.xlu0  ;;  %v371_v48 = vld [vmem:[%s1561_s21 + $0x5b0] sm:$0xff]  ;;  %v370_v49 = vld [vmem:[%s1561_s21 + $0x5a8] sm:$0xff] }
 0x14a   : > { %942 = vst [vmem:[%s1630_s24 + $0x588] sm:$0xff] %v569_v50  ;;  %878 = vst [vmem:[%s1630_s24 + $0x388] sm:$0xff] %v537_v51 }
 0x14d   : > { %682 = vxpose.xlu1.b32.cont [14/16] %v372_v52, 128  ;;  %v570_v54 = vpop.trf.xlu1  ;;  %650 = vxpose.xlu0.b32.cont [14/16] %v326_v53, 128  ;;  %v538_v55 = vpop.trf.xlu0  ;;  %v374_v52 = vld [vmem:[%s1561_s21 + $0x5c8] sm:$0xff]  ;;  %v373_v53 = vld [vmem:[%s1561_s21 + $0x5c0] sm:$0xff] }
 0x14e   : > { %946 = vst [vmem:[%s1630_s24 + $0x5a8] sm:$0xff] %v570_v54  ;;  %882 = vst [vmem:[%s1630_s24 + $0x3a8] sm:$0xff] %v538_v55 }
 0x151   : > { %683 = vxpose.xlu1.b32.cont [15/16] %v375_v56, 128  ;;  %v571_v58 = vpop.trf.xlu1  ;;  %651 = vxpose.xlu0.b32.cont [15/16] %v329_v57, 128  ;;  %v539_v59 = vpop.trf.xlu0  ;;  %v377_v56 = vld [vmem:[%s1561_s21 + $0x5e0] sm:$0xff]  ;;  %v376_v57 = vld [vmem:[%s1561_s21 + $0x5d8] sm:$0xff] }
 0x152   : > { %950 = vst [vmem:[%s1630_s24 + $0x5c8] sm:$0xff] %v571_v58  ;;  %886 = vst [vmem:[%s1630_s24 + $0x3c8] sm:$0xff] %v539_v59 }
 0x155   : > { %684 = vxpose.xlu1.b32.end [16/16] %v378_v60, 128  ;;  %v572_v62 = vpop.trf.xlu1  ;;  %652 = vxpose.xlu0.b32.end [16/16] %v332_v61, 128  ;;  %v540_v63 = vpop.trf.xlu0  ;;  %v380_v60 = vld [vmem:[%s1561_s21 + $0x5f8] sm:$0xff]  ;;  %v379_v61 = vld [vmem:[%s1561_s21 + $0x5f0] sm:$0xff] }
 0x156   : > { %954 = vst [vmem:[%s1630_s24 + $0x5e8] sm:$0xff] %v572_v62  ;;  %890 = vst [vmem:[%s1630_s24 + $0x3e8] sm:$0xff] %v540_v63 }
 0x159   : > { %733 = vxpose.xlu1.b32.start [1/16] %v335_v0, 128  ;;  %v621_v2 = vpop.trf.xlu1  ;;  %701 = vxpose.xlu0.b32.start [1/16] %v334_v1, 128  ;;  %v589_v3 = vpop.trf.xlu0 }
 0x15a   : > { %831 = vst [vmem:[%s1630_s24 + $0x210] sm:$0xff] %v621_v2  ;;  %767 = vst [vmem:[%s1630_s24 + $0x10] sm:$0xff] %v589_v3 }
 0x15d   : > { %734 = vxpose.xlu1.b32.cont [2/16] %v338_v4, 128  ;;  %v622_v6 = vpop.trf.xlu1  ;;  %702 = vxpose.xlu0.b32.cont [2/16] %v337_v5, 128  ;;  %v590_v7 = vpop.trf.xlu0 }
 0x15e   : > { %835 = vst [vmem:[%s1630_s24 + $0x230] sm:$0xff] %v622_v6  ;;  %771 = vst [vmem:[%s1630_s24 + $0x30] sm:$0xff] %v590_v7 }
 0x161   : > { %735 = vxpose.xlu1.b32.cont [3/16] %v341_v8, 128  ;;  %v623_v10 = vpop.trf.xlu1  ;;  %703 = vxpose.xlu0.b32.cont [3/16] %v340_v9, 128  ;;  %v591_v11 = vpop.trf.xlu0 }
 0x162   : > { %839 = vst [vmem:[%s1630_s24 + $0x250] sm:$0xff] %v623_v10  ;;  %775 = vst [vmem:[%s1630_s24 + $0x50] sm:$0xff] %v591_v11 }
 0x165   : > { %736 = vxpose.xlu1.b32.cont [4/16] %v344_v12, 128  ;;  %v624_v14 = vpop.trf.xlu1  ;;  %704 = vxpose.xlu0.b32.cont [4/16] %v343_v13, 128  ;;  %v592_v15 = vpop.trf.xlu0 }
 0x166   : > { %843 = vst [vmem:[%s1630_s24 + $0x270] sm:$0xff] %v624_v14  ;;  %779 = vst [vmem:[%s1630_s24 + $0x70] sm:$0xff] %v592_v15 }
 0x169   : > { %737 = vxpose.xlu1.b32.cont [5/16] %v347_v16, 128  ;;  %v625_v18 = vpop.trf.xlu1  ;;  %705 = vxpose.xlu0.b32.cont [5/16] %v346_v17, 128  ;;  %v593_v19 = vpop.trf.xlu0 }
 0x16a   : > { %847 = vst [vmem:[%s1630_s24 + $0x290] sm:$0xff] %v625_v18  ;;  %783 = vst [vmem:[%s1630_s24 + $0x90] sm:$0xff] %v593_v19 }
 0x16d   : > { %738 = vxpose.xlu1.b32.cont [6/16] %v350_v20, 128  ;;  %v626_v22 = vpop.trf.xlu1  ;;  %706 = vxpose.xlu0.b32.cont [6/16] %v349_v21, 128  ;;  %v594_v23 = vpop.trf.xlu0 }
 0x16e   : > { %851 = vst [vmem:[%s1630_s24 + $0x2b0] sm:$0xff] %v626_v22  ;;  %787 = vst [vmem:[%s1630_s24 + $0xb0] sm:$0xff] %v594_v23 }
 0x171   : > { %739 = vxpose.xlu1.b32.cont [7/16] %v353_v24, 128  ;;  %v627_v26 = vpop.trf.xlu1  ;;  %707 = vxpose.xlu0.b32.cont [7/16] %v352_v25, 128  ;;  %v595_v27 = vpop.trf.xlu0 }
 0x172   : > { %855 = vst [vmem:[%s1630_s24 + $0x2d0] sm:$0xff] %v627_v26  ;;  %791 = vst [vmem:[%s1630_s24 + $0xd0] sm:$0xff] %v595_v27 }
 0x175   : > { %740 = vxpose.xlu1.b32.cont [8/16] %v356_v28, 128  ;;  %v628_v30 = vpop.trf.xlu1  ;;  %708 = vxpose.xlu0.b32.cont [8/16] %v355_v29, 128  ;;  %v596_v31 = vpop.trf.xlu0 }
 0x176   : > { %859 = vst [vmem:[%s1630_s24 + $0x2f0] sm:$0xff] %v628_v30  ;;  %795 = vst [vmem:[%s1630_s24 + $0xf0] sm:$0xff] %v596_v31 }
 0x179   : > { %741 = vxpose.xlu1.b32.cont [9/16] %v359_v32, 128  ;;  %v629_v34 = vpop.trf.xlu1  ;;  %709 = vxpose.xlu0.b32.cont [9/16] %v358_v33, 128  ;;  %v597_v35 = vpop.trf.xlu0 }
 0x17a   : > { %863 = vst [vmem:[%s1630_s24 + $0x310] sm:$0xff] %v629_v34  ;;  %799 = vst [vmem:[%s1630_s24 + $0x110] sm:$0xff] %v597_v35 }
 0x17d   : > { %742 = vxpose.xlu1.b32.cont [10/16] %v362_v36, 128  ;;  %v630_v38 = vpop.trf.xlu1  ;;  %710 = vxpose.xlu0.b32.cont [10/16] %v361_v37, 128  ;;  %v598_v39 = vpop.trf.xlu0 }
 0x17e   : > { %867 = vst [vmem:[%s1630_s24 + $0x330] sm:$0xff] %v630_v38  ;;  %803 = vst [vmem:[%s1630_s24 + $0x130] sm:$0xff] %v598_v39 }
 0x181   : > { %743 = vxpose.xlu1.b32.cont [11/16] %v365_v40, 128  ;;  %v631_v42 = vpop.trf.xlu1  ;;  %711 = vxpose.xlu0.b32.cont [11/16] %v364_v41, 128  ;;  %v599_v43 = vpop.trf.xlu0 }
 0x182   : > { %871 = vst [vmem:[%s1630_s24 + $0x350] sm:$0xff] %v631_v42  ;;  %807 = vst [vmem:[%s1630_s24 + $0x150] sm:$0xff] %v599_v43 }
 0x185   : > { %744 = vxpose.xlu1.b32.cont [12/16] %v368_v44, 128  ;;  %v632_v46 = vpop.trf.xlu1  ;;  %712 = vxpose.xlu0.b32.cont [12/16] %v367_v45, 128  ;;  %v600_v47 = vpop.trf.xlu0 }
 0x186   : > { %875 = vst [vmem:[%s1630_s24 + $0x370] sm:$0xff] %v632_v46  ;;  %811 = vst [vmem:[%s1630_s24 + $0x170] sm:$0xff] %v600_v47 }
 0x189   : > { %745 = vxpose.xlu1.b32.cont [13/16] %v371_v48, 128  ;;  %v633_v50 = vpop.trf.xlu1  ;;  %713 = vxpose.xlu0.b32.cont [13/16] %v370_v49, 128  ;;  %v601_v51 = vpop.trf.xlu0 }
 0x18a   : > { %879 = vst [vmem:[%s1630_s24 + $0x390] sm:$0xff] %v633_v50  ;;  %815 = vst [vmem:[%s1630_s24 + $0x190] sm:$0xff] %v601_v51 }
 0x18d   : > { %746 = vxpose.xlu1.b32.cont [14/16] %v374_v52, 128  ;;  %v634_v54 = vpop.trf.xlu1  ;;  %714 = vxpose.xlu0.b32.cont [14/16] %v373_v53, 128  ;;  %v602_v55 = vpop.trf.xlu0 }
 0x18e   : > { %883 = vst [vmem:[%s1630_s24 + $0x3b0] sm:$0xff] %v634_v54  ;;  %819 = vst [vmem:[%s1630_s24 + $0x1b0] sm:$0xff] %v602_v55 }
 0x191   : > { %747 = vxpose.xlu1.b32.cont [15/16] %v377_v56, 128  ;;  %v635_v58 = vpop.trf.xlu1  ;;  %715 = vxpose.xlu0.b32.cont [15/16] %v376_v57, 128  ;;  %v603_v59 = vpop.trf.xlu0 }
 0x192   : > { %887 = vst [vmem:[%s1630_s24 + $0x3d0] sm:$0xff] %v635_v58  ;;  %823 = vst [vmem:[%s1630_s24 + $0x1d0] sm:$0xff] %v603_v59 }
 0x195   : > { %748 = vxpose.xlu1.b32.end [16/16] %v380_v60, 128  ;;  %v636_v62 = vpop.trf.xlu1  ;;  %716 = vxpose.xlu0.b32.end [16/16] %v379_v61, 128  ;;  %v604_v63 = vpop.trf.xlu0 }
 0x196   : > { %891 = vst [vmem:[%s1630_s24 + $0x3f0] sm:$0xff] %v636_v62  ;;  %827 = vst [vmem:[%s1630_s24 + $0x1f0] sm:$0xff] %v604_v63 }
 0x199   : > { %v685_v0 = vpop.trf.xlu1  ;;  %v653_v1 = vpop.trf.xlu0 }
 0x19a   : > { %768 = vst [vmem:[%s1630_s24 + $0x18] sm:$0xff] %v685_v0  ;;  %895 = vst [vmem:[%s1630_s24 + $0x410] sm:$0xff] %v653_v1 }
 0x19d   : > { %v686_v2 = vpop.trf.xlu1  ;;  %v654_v3 = vpop.trf.xlu0 }
 0x19e   : > { %772 = vst [vmem:[%s1630_s24 + $0x38] sm:$0xff] %v686_v2  ;;  %899 = vst [vmem:[%s1630_s24 + $0x430] sm:$0xff] %v654_v3 }
 0x1a1   : > { %v687_v4 = vpop.trf.xlu1  ;;  %v655_v5 = vpop.trf.xlu0 }
 0x1a2   : > { %776 = vst [vmem:[%s1630_s24 + $0x58] sm:$0xff] %v687_v4  ;;  %903 = vst [vmem:[%s1630_s24 + $0x450] sm:$0xff] %v655_v5 }
 0x1a5   : > { %v688_v6 = vpop.trf.xlu1  ;;  %v656_v7 = vpop.trf.xlu0 }
 0x1a6   : > { %780 = vst [vmem:[%s1630_s24 + $0x78] sm:$0xff] %v688_v6  ;;  %907 = vst [vmem:[%s1630_s24 + $0x470] sm:$0xff] %v656_v7 }
 0x1a9   : > { %v689_v8 = vpop.trf.xlu1  ;;  %v657_v9 = vpop.trf.xlu0 }
 0x1aa   : > { %784 = vst [vmem:[%s1630_s24 + $0x98] sm:$0xff] %v689_v8  ;;  %911 = vst [vmem:[%s1630_s24 + $0x490] sm:$0xff] %v657_v9 }
 0x1ad   : > { %v690_v10 = vpop.trf.xlu1  ;;  %v658_v11 = vpop.trf.xlu0 }
 0x1ae   : > { %788 = vst [vmem:[%s1630_s24 + $0xb8] sm:$0xff] %v690_v10  ;;  %915 = vst [vmem:[%s1630_s24 + $0x4b0] sm:$0xff] %v658_v11 }
 0x1b1   : > { %v691_v12 = vpop.trf.xlu1  ;;  %v659_v13 = vpop.trf.xlu0 }
 0x1b2   : > { %792 = vst [vmem:[%s1630_s24 + $0xd8] sm:$0xff] %v691_v12  ;;  %919 = vst [vmem:[%s1630_s24 + $0x4d0] sm:$0xff] %v659_v13 }
 0x1b5   : > { %v692_v14 = vpop.trf.xlu1  ;;  %v660_v15 = vpop.trf.xlu0 }
 0x1b6   : > { %796 = vst [vmem:[%s1630_s24 + $0xf8] sm:$0xff] %v692_v14  ;;  %923 = vst [vmem:[%s1630_s24 + $0x4f0] sm:$0xff] %v660_v15 }
 0x1b9   : > { %v693_v16 = vpop.trf.xlu1  ;;  %v661_v17 = vpop.trf.xlu0 }
 0x1ba   : > { %800 = vst [vmem:[%s1630_s24 + $0x118] sm:$0xff] %v693_v16  ;;  %927 = vst [vmem:[%s1630_s24 + $0x510] sm:$0xff] %v661_v17 }
 0x1bd   : > { %v694_v18 = vpop.trf.xlu1  ;;  %v662_v19 = vpop.trf.xlu0 }
 0x1be   : > { %804 = vst [vmem:[%s1630_s24 + $0x138] sm:$0xff] %v694_v18  ;;  %931 = vst [vmem:[%s1630_s24 + $0x530] sm:$0xff] %v662_v19 }
 0x1c1   : > { %v695_v20 = vpop.trf.xlu1  ;;  %v663_v21 = vpop.trf.xlu0 }
 0x1c2   : > { %808 = vst [vmem:[%s1630_s24 + $0x158] sm:$0xff] %v695_v20  ;;  %935 = vst [vmem:[%s1630_s24 + $0x550] sm:$0xff] %v663_v21 }
 0x1c5   : > { %v696_v22 = vpop.trf.xlu1  ;;  %v664_v23 = vpop.trf.xlu0 }
 0x1c6   : > { %812 = vst [vmem:[%s1630_s24 + $0x178] sm:$0xff] %v696_v22  ;;  %939 = vst [vmem:[%s1630_s24 + $0x570] sm:$0xff] %v664_v23 }
 0x1c9   : > { %v697_v24 = vpop.trf.xlu1  ;;  %v665_v25 = vpop.trf.xlu0 }
 0x1ca   : > { %816 = vst [vmem:[%s1630_s24 + $0x198] sm:$0xff] %v697_v24  ;;  %943 = vst [vmem:[%s1630_s24 + $0x590] sm:$0xff] %v665_v25 }
 0x1cd   : > { %v698_v26 = vpop.trf.xlu1  ;;  %v666_v27 = vpop.trf.xlu0 }
 0x1ce   : > { %820 = vst [vmem:[%s1630_s24 + $0x1b8] sm:$0xff] %v698_v26  ;;  %947 = vst [vmem:[%s1630_s24 + $0x5b0] sm:$0xff] %v666_v27 }
 0x1d1   : > { %v699_v28 = vpop.trf.xlu1  ;;  %v667_v29 = vpop.trf.xlu0 }
 0x1d2   : > { %824 = vst [vmem:[%s1630_s24 + $0x1d8] sm:$0xff] %v699_v28  ;;  %951 = vst [vmem:[%s1630_s24 + $0x5d0] sm:$0xff] %v667_v29 }
 0x1d5   : > { %v700_v30 = vpop.trf.xlu1  ;;  %v668_v31 = vpop.trf.xlu0 }
 0x1d6   : > { %828 = vst [vmem:[%s1630_s24 + $0x1f8] sm:$0xff] %v700_v30  ;;  %955 = vst [vmem:[%s1630_s24 + $0x5f0] sm:$0xff] %v668_v31 }
 0x1d9   : > { %v749_v32 = vpop.trf.xlu1  ;;  %v717_v33 = vpop.trf.xlu0 }
 0x1da   : > { %896 = vst [vmem:[%s1630_s24 + $0x418] sm:$0xff] %v749_v32  ;;  %832 = vst [vmem:[%s1630_s24 + $0x218] sm:$0xff] %v717_v33 }
 0x1dd   : > { %v750_v34 = vpop.trf.xlu1  ;;  %v718_v35 = vpop.trf.xlu0 }
 0x1de   : > { %900 = vst [vmem:[%s1630_s24 + $0x438] sm:$0xff] %v750_v34  ;;  %836 = vst [vmem:[%s1630_s24 + $0x238] sm:$0xff] %v718_v35 }
 0x1e1   : > { %v751_v36 = vpop.trf.xlu1  ;;  %v719_v37 = vpop.trf.xlu0 }
 0x1e2   : > { %904 = vst [vmem:[%s1630_s24 + $0x458] sm:$0xff] %v751_v36  ;;  %840 = vst [vmem:[%s1630_s24 + $0x258] sm:$0xff] %v719_v37 }
 0x1e5   : > { %v752_v38 = vpop.trf.xlu1  ;;  %v720_v39 = vpop.trf.xlu0 }
 0x1e6   : > { %908 = vst [vmem:[%s1630_s24 + $0x478] sm:$0xff] %v752_v38  ;;  %844 = vst [vmem:[%s1630_s24 + $0x278] sm:$0xff] %v720_v39 }
 0x1e9   : > { %v753_v40 = vpop.trf.xlu1  ;;  %v721_v41 = vpop.trf.xlu0 }
 0x1ea   : > { %912 = vst [vmem:[%s1630_s24 + $0x498] sm:$0xff] %v753_v40  ;;  %848 = vst [vmem:[%s1630_s24 + $0x298] sm:$0xff] %v721_v41 }
 0x1ed   : > { %v754_v42 = vpop.trf.xlu1  ;;  %v722_v43 = vpop.trf.xlu0 }
 0x1ee   : > { %916 = vst [vmem:[%s1630_s24 + $0x4b8] sm:$0xff] %v754_v42  ;;  %852 = vst [vmem:[%s1630_s24 + $0x2b8] sm:$0xff] %v722_v43 }
 0x1f1   : > { %v755_v44 = vpop.trf.xlu1  ;;  %v723_v45 = vpop.trf.xlu0 }
 0x1f2   : > { %920 = vst [vmem:[%s1630_s24 + $0x4d8] sm:$0xff] %v755_v44  ;;  %856 = vst [vmem:[%s1630_s24 + $0x2d8] sm:$0xff] %v723_v45 }
 0x1f5   : > { %v756_v46 = vpop.trf.xlu1  ;;  %v724_v47 = vpop.trf.xlu0 }
 0x1f6   : > { %924 = vst [vmem:[%s1630_s24 + $0x4f8] sm:$0xff] %v756_v46  ;;  %860 = vst [vmem:[%s1630_s24 + $0x2f8] sm:$0xff] %v724_v47 }
 0x1f9   : > { %v757_v48 = vpop.trf.xlu1  ;;  %v725_v49 = vpop.trf.xlu0 }
 0x1fa   : > { %928 = vst [vmem:[%s1630_s24 + $0x518] sm:$0xff] %v757_v48  ;;  %864 = vst [vmem:[%s1630_s24 + $0x318] sm:$0xff] %v725_v49 }
 0x1fd   : > { %v758_v50 = vpop.trf.xlu1  ;;  %v726_v51 = vpop.trf.xlu0 }
 0x1fe   : > { %932 = vst [vmem:[%s1630_s24 + $0x538] sm:$0xff] %v758_v50  ;;  %868 = vst [vmem:[%s1630_s24 + $0x338] sm:$0xff] %v726_v51 }
 0x201   : > { %v759_v52 = vpop.trf.xlu1  ;;  %v727_v53 = vpop.trf.xlu0 }
 0x202   : > { %936 = vst [vmem:[%s1630_s24 + $0x558] sm:$0xff] %v759_v52  ;;  %872 = vst [vmem:[%s1630_s24 + $0x358] sm:$0xff] %v727_v53 }
 0x205   : > { %v760_v54 = vpop.trf.xlu1  ;;  %v728_v55 = vpop.trf.xlu0 }
 0x206   : > { %940 = vst [vmem:[%s1630_s24 + $0x578] sm:$0xff] %v760_v54  ;;  %876 = vst [vmem:[%s1630_s24 + $0x378] sm:$0xff] %v728_v55 }
 0x209   : > { %v761_v56 = vpop.trf.xlu1  ;;  %v729_v57 = vpop.trf.xlu0 }
 0x20a   : > { %944 = vst [vmem:[%s1630_s24 + $0x598] sm:$0xff] %v761_v56  ;;  %880 = vst [vmem:[%s1630_s24 + $0x398] sm:$0xff] %v729_v57 }
 0x20d   : > { %v762_v58 = vpop.trf.xlu1  ;;  %v730_v59 = vpop.trf.xlu0 }
 0x20e   : > { %948 = vst [vmem:[%s1630_s24 + $0x5b8] sm:$0xff] %v762_v58  ;;  %884 = vst [vmem:[%s1630_s24 + $0x3b8] sm:$0xff] %v730_v59 }
 0x210   : > { %963 = sbr.rel (!%p1545_p3) target bundleno = 584 (0x248), region = 28 }
 0x211   : > { %v763_v60 = vpop.trf.xlu1  ;;  %v731_v61 = vpop.trf.xlu0 }
 0x212   : > { %952 = vst [vmem:[%s1630_s24 + $0x5d8] sm:$0xff] %v763_v60  ;;  %888 = vst [vmem:[%s1630_s24 + $0x3d8] sm:$0xff] %v731_v61 }
 0x215   : > { %v764_v62 = vpop.trf.xlu1  ;;  %v732_v63 = vpop.trf.xlu0 }
 0x216   : > { %956 = vst [vmem:[%s1630_s24 + $0x5f8] sm:$0xff] %v764_v62  ;;  %892 = vst [vmem:[%s1630_s24 + $0x3f8] sm:$0xff] %v732_v63 }
 0x217 LB: >> { %s1119_s4 = sadd.s32 1, %s1481_s2  ;;  %s985_s3 = sadd.s32 1, %s1485_s3   ;;  %s1485_s3 = sphi %s1966_s3, %s985_s3   ;;  %s1481_s2 = sphi %s1964_s2, %s2173_s2   ;;  %s1477_s30 = sphi %s2170_s30, %s2172_s30   ;;  %s1473_s29 = sphi %s2169_s29, %s2171_s29  }
 0x218   : >> { %p1120_p9 = scmp.ge.s32.totalorder %s1119_s4, 2  ;;  %p984_p10 = scmp.ge.s32.totalorder %s985_s3, 2 }
 0x219   : > { %s1130_s11 = scalar_lea.vmem (%p984_p10), %s1630_s24, 1024 [#allocation2]   ;;  %s1132_s13 = scalar_lea.vmem (%p984_p10), %s1956_s28, 1024  }
 0x21a   : >> { %s2182_s4 = smov (%p1120_p9, %s1119_s4), 0  ;;  %s2133_s14 = smov (%p984_p10), 0  }
 0x21b   : >> { %s1282_s5 = sshll.u32 %s2182_s4, 9  ;;  %s2173_s2 = smov %s2182_s4 }
 0x21c   : >> { %s2021_s6 = scalar_lea.vmem %s1630_s24, %s1282_s5 [#allocation2]   ;;  %s2024_s8 = scalar_lea.vmem %s1956_s28, %s1282_s5  }
 0x21d   : >> { %v991_v0 = vld [vmem:[%s1477_s30] sm:$0xff]  ;;  %v1023_v16 = vld [vmem:[%s1477_s30 + $0x8] sm:$0xff]  ;;  %v1055_v32 = vld [vmem:[%s1477_s30 + $0x10] sm:$0xff]  ;;  %s2135_s15 = smov (%p984_p10), 0  }
 0x21e   : >> { %v993_v1 = vld [vmem:[%s1477_s30 + $0x20] sm:$0xff]  ;;  %992 = vst [vmem:[%s1473_s29] sm:$0xff] %v991_v0  ;;  %v1025_v17 = vld [vmem:[%s1477_s30 + $0x28] sm:$0xff]  ;;  %1024 = vst [vmem:[%s1473_s29 + $0x8] sm:$0xff] %v1023_v16 }
 0x21f   : >> { %v995_v2 = vld [vmem:[%s1477_s30 + $0x40] sm:$0xff]  ;;  %994 = vst [vmem:[%s1473_s29 + $0x20] sm:$0xff] %v993_v1  ;;  %1026 = vst [vmem:[%s1473_s29 + $0x28] sm:$0xff] %v1025_v17  ;;  %v1027_v18 = vld [vmem:[%s1477_s30 + $0x48] sm:$0xff] }
 0x220   : >> { %996 = vst [vmem:[%s1473_s29 + $0x40] sm:$0xff] %v995_v2  ;;  %v997_v3 = vld [vmem:[%s1477_s30 + $0x60] sm:$0xff]  ;;  %v1029_v19 = vld [vmem:[%s1477_s30 + $0x68] sm:$0xff]  ;;  %1028 = vst [vmem:[%s1473_s29 + $0x48] sm:$0xff] %v1027_v18 }
 0x221   : >> { %v999_v4 = vld [vmem:[%s1477_s30 + $0x80] sm:$0xff]  ;;  %998 = vst [vmem:[%s1473_s29 + $0x60] sm:$0xff] %v997_v3  ;;  %v1031_v20 = vld [vmem:[%s1477_s30 + $0x88] sm:$0xff]  ;;  %1030 = vst [vmem:[%s1473_s29 + $0x68] sm:$0xff] %v1029_v19 }
 0x222   : >> { %v1001_v5 = vld [vmem:[%s1477_s30 + $0xa0] sm:$0xff]  ;;  %1000 = vst [vmem:[%s1473_s29 + $0x80] sm:$0xff] %v999_v4  ;;  %1032 = vst [vmem:[%s1473_s29 + $0x88] sm:$0xff] %v1031_v20  ;;  %v1033_v21 = vld [vmem:[%s1477_s30 + $0xa8] sm:$0xff] }
 0x223   : >> { %1002 = vst [vmem:[%s1473_s29 + $0xa0] sm:$0xff] %v1001_v5  ;;  %v1003_v6 = vld [vmem:[%s1477_s30 + $0xc0] sm:$0xff]  ;;  %v1035_v22 = vld [vmem:[%s1477_s30 + $0xc8] sm:$0xff]  ;;  %1034 = vst [vmem:[%s1473_s29 + $0xa8] sm:$0xff] %v1033_v21 }
 0x224   : >> { %v1005_v7 = vld [vmem:[%s1477_s30 + $0xe0] sm:$0xff]  ;;  %1004 = vst [vmem:[%s1473_s29 + $0xc0] sm:$0xff] %v1003_v6  ;;  %v1037_v23 = vld [vmem:[%s1477_s30 + $0xe8] sm:$0xff]  ;;  %1036 = vst [vmem:[%s1473_s29 + $0xc8] sm:$0xff] %v1035_v22 }
 0x225   : >> { %v1007_v8 = vld [vmem:[%s1477_s30 + $0x100] sm:$0xff]  ;;  %1006 = vst [vmem:[%s1473_s29 + $0xe0] sm:$0xff] %v1005_v7  ;;  %1038 = vst [vmem:[%s1473_s29 + $0xe8] sm:$0xff] %v1037_v23  ;;  %v1039_v24 = vld [vmem:[%s1477_s30 + $0x108] sm:$0xff] }
 0x226   : >> { %1008 = vst [vmem:[%s1473_s29 + $0x100] sm:$0xff] %v1007_v8  ;;  %v1009_v9 = vld [vmem:[%s1477_s30 + $0x120] sm:$0xff]  ;;  %v1041_v25 = vld [vmem:[%s1477_s30 + $0x128] sm:$0xff]  ;;  %1040 = vst [vmem:[%s1473_s29 + $0x108] sm:$0xff] %v1039_v24 }
 0x227   : >> { %v1011_v10 = vld [vmem:[%s1477_s30 + $0x140] sm:$0xff]  ;;  %1010 = vst [vmem:[%s1473_s29 + $0x120] sm:$0xff] %v1009_v9  ;;  %v1043_v26 = vld [vmem:[%s1477_s30 + $0x148] sm:$0xff]  ;;  %1042 = vst [vmem:[%s1473_s29 + $0x128] sm:$0xff] %v1041_v25 }
 0x228   : >> { %v1013_v11 = vld [vmem:[%s1477_s30 + $0x160] sm:$0xff]  ;;  %1012 = vst [vmem:[%s1473_s29 + $0x140] sm:$0xff] %v1011_v10  ;;  %1044 = vst [vmem:[%s1473_s29 + $0x148] sm:$0xff] %v1043_v26  ;;  %v1045_v27 = vld [vmem:[%s1477_s30 + $0x168] sm:$0xff] }
 0x229   : >> { %1014 = vst [vmem:[%s1473_s29 + $0x160] sm:$0xff] %v1013_v11  ;;  %v1015_v12 = vld [vmem:[%s1477_s30 + $0x180] sm:$0xff]  ;;  %v1047_v28 = vld [vmem:[%s1477_s30 + $0x188] sm:$0xff]  ;;  %1046 = vst [vmem:[%s1473_s29 + $0x168] sm:$0xff] %v1045_v27 }
 0x22a   : >> { %v1017_v13 = vld [vmem:[%s1477_s30 + $0x1a0] sm:$0xff]  ;;  %1016 = vst [vmem:[%s1473_s29 + $0x180] sm:$0xff] %v1015_v12  ;;  %v1049_v29 = vld [vmem:[%s1477_s30 + $0x1a8] sm:$0xff]  ;;  %1048 = vst [vmem:[%s1473_s29 + $0x188] sm:$0xff] %v1047_v28 }
 0x22b   : >> { %v1019_v14 = vld [vmem:[%s1477_s30 + $0x1c0] sm:$0xff]  ;;  %1018 = vst [vmem:[%s1473_s29 + $0x1a0] sm:$0xff] %v1017_v13  ;;  %1050 = vst [vmem:[%s1473_s29 + $0x1a8] sm:$0xff] %v1049_v29  ;;  %v1051_v30 = vld [vmem:[%s1477_s30 + $0x1c8] sm:$0xff] }
 0x22c   : >> { %1020 = vst [vmem:[%s1473_s29 + $0x1c0] sm:$0xff] %v1019_v14  ;;  %v1021_v15 = vld [vmem:[%s1477_s30 + $0x1e0] sm:$0xff]  ;;  %v1053_v31 = vld [vmem:[%s1477_s30 + $0x1e8] sm:$0xff]  ;;  %1052 = vst [vmem:[%s1473_s29 + $0x1c8] sm:$0xff] %v1051_v30 }
 0x22d   : >> { %1022 = vst [vmem:[%s1473_s29 + $0x1e0] sm:$0xff] %v1021_v15  ;;  %1054 = vst [vmem:[%s1473_s29 + $0x1e8] sm:$0xff] %v1053_v31  ;;  %v1057_v33 = vld [vmem:[%s1477_s30 + $0x30] sm:$0xff]  ;;  %v1087_v48 = vld [vmem:[%s1477_s30 + $0x18] sm:$0xff] }
 0x22e   : >> { %1056 = vst [vmem:[%s1473_s29 + $0x10] sm:$0xff] %v1055_v32  ;;  %v1059_v34 = vld [vmem:[%s1477_s30 + $0x50] sm:$0xff]  ;;  %1058 = vst [vmem:[%s1473_s29 + $0x30] sm:$0xff] %v1057_v33  ;;  %v1089_v49 = vld [vmem:[%s1477_s30 + $0x38] sm:$0xff] }
 0x22f   : >> { %v1061_v35 = vld [vmem:[%s1477_s30 + $0x70] sm:$0xff]  ;;  %1060 = vst [vmem:[%s1473_s29 + $0x50] sm:$0xff] %v1059_v34  ;;  %v1091_v50 = vld [vmem:[%s1477_s30 + $0x58] sm:$0xff]  ;;  %1088 = vst [vmem:[%s1473_s29 + $0x18] sm:$0xff] %v1087_v48 }
 0x230   : >> { %1062 = vst [vmem:[%s1473_s29 + $0x70] sm:$0xff] %v1061_v35  ;;  %v1063_v36 = vld [vmem:[%s1477_s30 + $0x90] sm:$0xff]  ;;  %1090 = vst [vmem:[%s1473_s29 + $0x38] sm:$0xff] %v1089_v49  ;;  %v1093_v51 = vld [vmem:[%s1477_s30 + $0x78] sm:$0xff] }
 0x231   : >> { %v1065_v37 = vld [vmem:[%s1477_s30 + $0xb0] sm:$0xff]  ;;  %1064 = vst [vmem:[%s1473_s29 + $0x90] sm:$0xff] %v1063_v36  ;;  %1092 = vst [vmem:[%s1473_s29 + $0x58] sm:$0xff] %v1091_v50  ;;  %v1095_v52 = vld [vmem:[%s1477_s30 + $0x98] sm:$0xff] }
 0x232   : >> { %v1067_v38 = vld [vmem:[%s1477_s30 + $0xd0] sm:$0xff]  ;;  %1066 = vst [vmem:[%s1473_s29 + $0xb0] sm:$0xff] %v1065_v37  ;;  %v1097_v53 = vld [vmem:[%s1477_s30 + $0xb8] sm:$0xff]  ;;  %1094 = vst [vmem:[%s1473_s29 + $0x78] sm:$0xff] %v1093_v51 }
 0x233   : >> { %1068 = vst [vmem:[%s1473_s29 + $0xd0] sm:$0xff] %v1067_v38  ;;  %v1069_v39 = vld [vmem:[%s1477_s30 + $0xf0] sm:$0xff]  ;;  %1096 = vst [vmem:[%s1473_s29 + $0x98] sm:$0xff] %v1095_v52  ;;  %v1099_v54 = vld [vmem:[%s1477_s30 + $0xd8] sm:$0xff] }
 0x234   : >> { %v1071_v40 = vld [vmem:[%s1477_s30 + $0x110] sm:$0xff]  ;;  %1070 = vst [vmem:[%s1473_s29 + $0xf0] sm:$0xff] %v1069_v39  ;;  %1098 = vst [vmem:[%s1473_s29 + $0xb8] sm:$0xff] %v1097_v53  ;;  %v1101_v55 = vld [vmem:[%s1477_s30 + $0xf8] sm:$0xff] }
 0x235   : >> { %v1073_v41 = vld [vmem:[%s1477_s30 + $0x130] sm:$0xff]  ;;  %1072 = vst [vmem:[%s1473_s29 + $0x110] sm:$0xff] %v1071_v40  ;;  %v1103_v56 = vld [vmem:[%s1477_s30 + $0x118] sm:$0xff]  ;;  %1100 = vst [vmem:[%s1473_s29 + $0xd8] sm:$0xff] %v1099_v54 }
 0x236   : >> { %1074 = vst [vmem:[%s1473_s29 + $0x130] sm:$0xff] %v1073_v41  ;;  %v1075_v42 = vld [vmem:[%s1477_s30 + $0x150] sm:$0xff]  ;;  %1102 = vst [vmem:[%s1473_s29 + $0xf8] sm:$0xff] %v1101_v55  ;;  %v1105_v57 = vld [vmem:[%s1477_s30 + $0x138] sm:$0xff] }
 0x237   : >> { %v1077_v43 = vld [vmem:[%s1477_s30 + $0x170] sm:$0xff]  ;;  %1076 = vst [vmem:[%s1473_s29 + $0x150] sm:$0xff] %v1075_v42  ;;  %1104 = vst [vmem:[%s1473_s29 + $0x118] sm:$0xff] %v1103_v56  ;;  %v1107_v58 = vld [vmem:[%s1477_s30 + $0x158] sm:$0xff]  ;;  %987 = sbr.rel (!%p984_p10) target bundleno = 535 (0x217), region = 86 }
 0x238   : >> { %v1079_v44 = vld [vmem:[%s1477_s30 + $0x190] sm:$0xff]  ;;  %1078 = vst [vmem:[%s1473_s29 + $0x170] sm:$0xff] %v1077_v43  ;;  %v1109_v59 = vld [vmem:[%s1477_s30 + $0x178] sm:$0xff]  ;;  %1106 = vst [vmem:[%s1473_s29 + $0x138] sm:$0xff] %v1105_v57 }
 0x239   : >> { %1080 = vst [vmem:[%s1473_s29 + $0x190] sm:$0xff] %v1079_v44  ;;  %v1081_v45 = vld [vmem:[%s1477_s30 + $0x1b0] sm:$0xff]  ;;  %1108 = vst [vmem:[%s1473_s29 + $0x158] sm:$0xff] %v1107_v58  ;;  %v1111_v60 = vld [vmem:[%s1477_s30 + $0x198] sm:$0xff] }
 0x23a   : >> { %v1083_v46 = vld [vmem:[%s1477_s30 + $0x1d0] sm:$0xff]  ;;  %1082 = vst [vmem:[%s1473_s29 + $0x1b0] sm:$0xff] %v1081_v45  ;;  %1110 = vst [vmem:[%s1473_s29 + $0x178] sm:$0xff] %v1109_v59  ;;  %v1113_v61 = vld [vmem:[%s1477_s30 + $0x1b8] sm:$0xff] }
 0x23b   : >> { %v1085_v47 = vld [vmem:[%s1477_s30 + $0x1f0] sm:$0xff]  ;;  %1084 = vst [vmem:[%s1473_s29 + $0x1d0] sm:$0xff] %v1083_v46  ;;  %v1115_v62 = vld [vmem:[%s1477_s30 + $0x1d8] sm:$0xff]  ;;  %1112 = vst [vmem:[%s1473_s29 + $0x198] sm:$0xff] %v1111_v60 }
 0x23c   : >> { %1086 = vst [vmem:[%s1473_s29 + $0x1f0] sm:$0xff] %v1085_v47  ;;  %1114 = vst [vmem:[%s1473_s29 + $0x1b8] sm:$0xff] %v1113_v61  ;;  %v1117_v63 = vld [vmem:[%s1477_s30 + $0x1f8] sm:$0xff]  ;;  %s2172_s30 = smov %s2021_s6 }
 0x23d   : >> { %1116 = vst [vmem:[%s1473_s29 + $0x1d8] sm:$0xff] %v1115_v62  ;;  %1118 = vst [vmem:[%s1473_s29 + $0x1f8] sm:$0xff] %v1117_v63  ;;  %s2171_s29 = smov %s2024_s8 }
 0x23e LB: >> { %v1142_v0 = vld [vmem:[%s1493_s11] sm:$0xff]  ;;  %v1144_v1 = vld [vmem:[%s1493_s11 + $0x8] sm:$0xff]  ;;  %v1146_v2 = vld [vmem:[%s1493_s11 + $0x10] sm:$0xff]  ;;  %s1150_s17 = sadd.s32 1, %s1497_s14  ;;  %s1136_s15 = sadd.s32 1, %s1501_s15   ;;  %s1501_s15 = sphi %s2135_s15, %s1136_s15   ;;  %s1497_s14 = sphi %s2133_s14, %s2174_s14   ;;  %s1493_s11 = sphi %s1130_s11, %s1287_s11   ;;  %s1489_s13 = sphi %s1132_s13, %s1289_s13  }
 0x23f   : >> { %1143 = vst [vmem:[%s1489_s13] sm:$0xff] %v1142_v0  ;;  %1145 = vst [vmem:[%s1489_s13 + $0x8] sm:$0xff] %v1144_v1  ;;  %v1148_v3 = vld [vmem:[%s1493_s11 + $0x18] sm:$0xff]  ;;  %p1151_p11 = scmp.ge.s32.totalorder %s1150_s17, 6  ;;  %p1135_p12 = scmp.ge.s32.totalorder %s1136_s15, 6 }
 0x240   : >> { %1147 = vst [vmem:[%s1489_s13 + $0x10] sm:$0xff] %v1146_v2  ;;  %1149 = vst [vmem:[%s1489_s13 + $0x18] sm:$0xff] %v1148_v3 }
 0x241   : >> { %s2184_s17 = smov (%p1151_p11, %s1150_s17), 0  ;;  %1138 = sbr.rel (!%p1135_p12) target bundleno = 574 (0x23e), region = 97 }
 0x242   : >> { %s1284_s18 = sshll.u32 %s2184_s17, 5  ;;  %s2174_s14 = smov %s2184_s17 }
 0x243   : >> { %s1286_s19 = scalar_lea.vmem %s1630_s24, %s1284_s18 [#allocation2]  ;;  %s1288_s20 = scalar_lea.vmem %s1956_s28, %s1284_s18 }
 0x244   : >> { %s1287_s11 = scalar_lea.vmem %s1286_s19, 1024 [#allocation2]   ;;  %s1289_s13 = scalar_lea.vmem %s1288_s20, 1024  }
 0x248 PF: > { %s11_s10 = sadd.s32 1, %s1469_s10   ;;  %s2175_s6 = smov %s1457_s7 }
 0x249   : > { %p8_p13 = scmp.ge.s32.totalorder %s11_s10, 4   ;;  %s2176_s7 = smov %s1554_s16 }
 0x24a   : > { %s2177_s8 = smov %s1465_s9  ;;  %s2178_s9 = smov %s2180_s12 }
 0x24b   :  { %10 = sbr.rel (!%p8_p13) target bundleno = 3 (0x3), region = 108 }

</bundles_post_ra>
